<compile_context>
chip_gen: v7x
topology: tpu7x:2x2x1
jax: 0.10.0
libtpu: 0.0.40
codegen_flags: <defaults>
</compile_context>

<pallas_src>
import functools

import jax
import jax.numpy as jnp
from jax.experimental import pallas as pl
from jax.experimental.pallas import tpu as pltpu


def _round_up(n, m):
    return ((n + m - 1) // m) * m


def _pick_tile(L_p):
    """Largest 128-aligned tile <= 512 that divides L_p (L_p is 128-padded)."""
    for t in (512, 256, 128):
        if L_p % t == 0:
            return t
    return L_p  # unreachable for 128-padded L_p


def _largest_divisor_le(n, cap):
    cap = max(1, min(n, cap))
    for d in range(cap, 0, -1):
        if n % d == 0:
            return d
    return 1


# ---------------------------------------------------------------------------
# One GCN layer:  relu( ((A X + X) / (rowsum(A)+1)) @ W_t + b )
# ---------------------------------------------------------------------------
def _gcn_layer_kernel(adj_ref, x_ref, w_ref, b_ref, out_ref, acc_ref, deg_ref,
                      *, x_resident, tm, tk, approx_recip):
    # adj_ref: (Bt, TM, TK)        raw adjacency tile (rows i, cols k)
    # x_ref  : (Bt, L_p, Dp_in)    resident state   (x_resident=True)
    #          (Bt, TK, Dp_in)     per-K-tile state (x_resident=False)
    # w_ref  : (Dp_in, Dp_out)     pre-transposed, zero-padded weight
    # b_ref  : (1, Dp_out)         f32 zero-padded bias
    # out_ref: (Bt, TM, Dp_out)
    # acc_ref: (Bt, TM, Dp_in) f32 scratch;  deg_ref: (Bt, TM, 1) f32 scratch
    i = pl.program_id(1)
    k = pl.program_id(2)

    @pl.when(k == 0)
    def _():
        acc_ref[...] = jnp.zeros_like(acc_ref)
        deg_ref[...] = jnp.zeros_like(deg_ref)

    adj = adj_ref[...]                                            # (Bt, TM, TK)
    if x_resident:
        xk = x_ref[:, pl.ds(pl.multiple_of(k * tk, tk), tk), :]   # (Bt, TK, Dp)
    else:
        xk = x_ref[...]                                           # (Bt, TK, Dp)

    acc_ref[...] += jnp.einsum("bik,bkd->bid", adj, xk,
                               preferred_element_type=jnp.float32)
    deg_ref[...] += jnp.sum(adj.astype(jnp.float32), axis=-1, keepdims=True)

    if not x_resident:
        # Self-loop term: since tm == tk, the xk block IS the xi block at k==i.
        @pl.when(k == i)
        def _():
            acc_ref[...] += xk.astype(jnp.float32)

    @pl.when(k == pl.num_programs(2) - 1)
    def _():
        # D^-1 (A + I) X  ==  (A X + X) * 1/(rowsum(A) + 1)
        inv = pl.reciprocal(deg_ref[...] + 1.0, approx=approx_recip)  # (Bt,TM,1)
        if x_resident:
            xi = x_ref[:, pl.ds(pl.multiple_of(i * tm, tm), tm), :]
            h = (acc_ref[...] + xi.astype(jnp.float32)) * inv
        else:
            h = acc_ref[...] * inv
        y = jnp.einsum("bid,de->bie", h.astype(w_ref.dtype), w_ref[...],
                       preferred_element_type=jnp.float32)        # (Bt,TM,Dpo)
        y = y + b_ref[...].astype(jnp.float32)
        out_ref[...] = jnp.maximum(y, 0.0).astype(out_ref.dtype)


def gcn_layer(adj_p, state_p, w_t_p, b_p, *, approx_recip):
    """One GCN layer on padded inputs.

    adj_p   : (B, L_p, L_p)     raw adjacency (zero-padded, no self loops)
    state_p : (B, L_p, Dp_in)   features, dims padded to multiples of 128
    w_t_p   : (Dp_in, Dp_out)   pre-transposed, zero-padded weight
    b_p     : (1, Dp_out)       f32 zero-padded bias
    returns : (B, L_p, Dp_out)  in state_p.dtype
    """
    B, L_p, dp_in = state_p.shape
    dp_out = w_t_p.shape[1]
    tm = tk = _pick_tile(L_p)

    adj_b = adj_p.dtype.itemsize
    x_b = state_p.dtype.itemsize
    w_b = w_t_p.dtype.itemsize

    # Small-graph regime: fold batch elements into one block to amortize the
    # per-grid-step overhead and raise MXU occupancy.
    if L_p <= 256:
        per_elem = (2 * tm * tk * adj_b            # adj, double-buffered
                    + 2 * L_p * dp_in * x_b        # resident X, double-buffered
                    + 2 * tm * dp_out * x_b        # out, double-buffered
                    + tm * dp_in * 4 + tm * 4)     # f32 scratch
        cap = max(1, (8 << 20) // max(per_elem, 1))
        cap = min(cap, 8, (B + 1) // 2 if B >= 4 else B)  # keep >=2 groups if B>=4
        Bt = _largest_divisor_le(B, cap)
    else:
        Bt = 1

    # Keep X resident in VMEM per batch group (read from HBM once per layer
    # instead of once per i-tile) whenever it comfortably fits.
    x_resident = (2 * Bt * L_p * dp_in * x_b) <= (16 << 20)

    # VMEM budget estimate: double-buffered streams + W/bias + f32 scratch.
    est = (2 * Bt * tm * tk * adj_b
           + (2 * Bt * L_p * dp_in * x_b if x_resident
              else 2 * Bt * tk * dp_in * x_b)
           + 2 * Bt * tm * dp_out * x_b
           + 2 * dp_in * dp_out * w_b + 2 * dp_out * 4
           + Bt * tm * dp_in * 4 + Bt * tm * 4)
    vmem_limit = int(min(max(2 * est, 32 << 20), 64 << 20))

    grid = (B // Bt, L_p // tm, L_p // tk)

    if x_resident:
        x_spec = pl.BlockSpec((Bt, L_p, dp_in), lambda g, i, k: (g, 0, 0))
    else:
        x_spec = pl.BlockSpec((Bt, tk, dp_in), lambda g, i, k: (g, k, 0))

    kernel = functools.partial(_gcn_layer_kernel, x_resident=x_resident,
                               tm=tm, tk=tk, approx_recip=approx_recip)

    return pl.pallas_call(
        kernel,
        out_shape=jax.ShapeDtypeStruct((B, L_p, dp_out), state_p.dtype),
        grid=grid,
        in_specs=[
            pl.BlockSpec((Bt, tm, tk), lambda g, i, k: (g, i, k)),   # adj
            x_spec,                                                  # X
            pl.BlockSpec((dp_in, dp_out), lambda g, i, k: (0, 0)),   # W^T
            pl.BlockSpec((1, dp_out), lambda g, i, k: (0, 0)),       # bias (f32)
        ],
        out_specs=pl.BlockSpec((Bt, tm, dp_out), lambda g, i, k: (g, i, 0)),
        scratch_shapes=[
            pltpu.VMEM((Bt, tm, dp_in), jnp.float32),   # A@X accumulator
            pltpu.VMEM((Bt, tm, 1), jnp.float32),       # row-degree accumulator
        ],
        compiler_params=pltpu.CompilerParams(
            dimension_semantics=("parallel", "parallel", "arbitrary"),
            vmem_limit_bytes=vmem_limit),
    )(adj_p, state_p, w_t_p, b_p)


# ---------------------------------------------------------------------------
# Full GCN forward
# ---------------------------------------------------------------------------
@functools.partial(jax.jit, static_argnames=("compute_dtype",))
def gcn_forward(adj, state, weights, biases, *, compute_dtype=jnp.bfloat16):
    B, L, d_in = state.shape
    cdt = jnp.dtype(compute_dtype)
    approx_recip = cdt != jnp.dtype(jnp.float32)

    L_p = _round_up(L, 128)
    dp = _round_up(d_in, 128)

    # Zero padding is exact: padded adj rows/cols are zero (deg 0 -> 1/(0+1)),
    # padded feature columns stay zero through every layer, padded L rows are
    # sliced off at the end.
    adj_p = jnp.pad(adj, ((0, 0), (0, L_p - L), (0, L_p - L))).astype(cdt)
    state_p = jnp.pad(state, ((0, 0), (0, L_p - L), (0, dp - d_in))).astype(cdt)

    for w, b in zip(weights, biases):
        dout, din = w.shape
        dp_in = _round_up(din, 128)
        dp_out = _round_up(dout, 128)
        # Pre-transpose to (Din, Dout) on the host; zero-pad to 128 multiples.
        w_t_p = jnp.pad(w.T, ((0, dp_in - din), (0, dp_out - dout))).astype(cdt)
        b_p = jnp.pad(b, (0, dp_out - dout)).reshape(1, dp_out).astype(jnp.float32)
        state_p = gcn_layer(adj_p, state_p, w_t_p, b_p, approx_recip=approx_recip)

    d_out = weights[-1].shape[0]
    return state_p[:, :L, :d_out].astype(state.dtype)


def init_gcn_params(key, input_size, hidden_size, num_layers):
    """Deterministic init matching nn.Linear default (uniform +-1/sqrt(fan_in))."""
    weights, biases = [], []
    in_dim = input_size
    for _ in range(num_layers):
        key, kw, kb = jax.random.split(key, 3)
        bound = 1.0 / jnp.sqrt(jnp.float32(in_dim))
        w = jax.random.uniform(kw, (hidden_size, in_dim), jnp.float32,
                               minval=-bound, maxval=bound)
        b = jax.random.uniform(kb, (hidden_size,), jnp.float32,
                               minval=-bound, maxval=bound)
        weights.append(w)
        biases.append(b)
        in_dim = hidden_size
    return weights, biases


def gcn_reference(adj, state, weights, biases):
    """Pure-JAX reference matching the PyTorch forward."""
    L = adj.shape[1]
    adj = adj + jnp.eye(L, dtype=adj.dtype)[None]
    adj = adj / jnp.sum(adj, axis=2, keepdims=True)
    for w, b in zip(weights, biases):
        state = jax.nn.relu(jnp.einsum("blm,bmd->bld", adj, state) @ w.T + b)
    return state


if __name__ == "__main__":
    # Small shapes: batch=2, length=8, input_size=16, hidden_size=32, layers=2
    B, L, D_IN, D_H, N_LAYERS = 2, 8, 16, 32, 2

    key = jax.random.PRNGKey(0)
    k_adj, k_x, k_params = jax.random.split(key, 3)

    # Random non-negative adjacency (soft edge weights), float32.
    adj = jax.random.uniform(k_adj, (B, L, L), jnp.float32)
    x = jax.random.normal(k_x, (B, L, D_IN), jnp.float32)

    weights, biases = init_gcn_params(k_params, D_IN, D_H, N_LAYERS)

    ref = gcn_reference(adj, x, weights, biases)

    # Exact-precision path (f32 operands everywhere) for the strict check.
    out_f32 = jax.block_until_ready(
        gcn_forward(adj, x, weights, biases, compute_dtype=jnp.float32))
    assert out_f32.shape == (B, L, D_H)
    assert jnp.allclose(out_f32, ref, atol=1e-4, rtol=1e-4), "f32 mismatch vs ref"

    # Production path: bf16 MXU operands, f32 accumulation / epilogue.
    out_bf16 = jax.block_until_ready(
        gcn_forward(adj, x, weights, biases, compute_dtype=jnp.bfloat16))
    assert out_bf16.shape == (B, L, D_H)
    assert jnp.allclose(out_bf16, ref, atol=5e-2, rtol=5e-2), "bf16 mismatch vs ref"

    print("KERNEL_OK")
</pallas_src>

<mosaic_0001>
module attributes {stable_mosaic.version = 11 : i64} {
  func.func @_gcn_layer_kernel(%arg0: i32, %arg1: i32, %arg2: i32, %arg3: memref<2x128x128xf32, #tpu.memory_space<vmem>>, %arg4: memref<2x128x128xf32, #tpu.memory_space<vmem>>, %arg5: memref<128x128xf32, #tpu.memory_space<vmem>>, %arg6: memref<1x128xf32, #tpu.memory_space<vmem>>, %arg7: memref<2x128x128xf32, #tpu.memory_space<vmem>>, %arg8: memref<2x128x128xf32, #tpu.memory_space<vmem>>, %arg9: memref<2x128x1xf32, #tpu.memory_space<vmem>>) attributes {dimension_semantics = [#tpu.dimension_semantics<parallel>, #tpu.dimension_semantics<parallel>, #tpu.dimension_semantics<arbitrary>], iteration_bounds = array<i64: 1, 1, 1>, scalar_prefetch = 0 : i64, scratch_operands = 2 : i64, tpu.core_type = #tpu.core_type<tc>, window_params = [{transform_indices = @transform_0, window_bounds = array<i64: 2, 128, 128>}, {transform_indices = @transform_1, window_bounds = array<i64: 2, 128, 128>}, {pipeline_mode = #tpu.pipeline_mode<synchronous>, transform_indices = @transform_2, window_bounds = array<i64: 128, 128>}, {pipeline_mode = #tpu.pipeline_mode<synchronous>, transform_indices = @transform_3, window_bounds = array<i64: 1, 128>}, {transform_indices = @transform_4, window_bounds = array<i64: 2, 128, 128>}]} {
    %c0_i32 = arith.constant 0 : i32
    %0 = arith.cmpi eq, %arg2, %c0_i32 : i32
    %1 = arith.extui %0 : i1 to i32
    %c0_i32_0 = arith.constant 0 : i32
    %2 = arith.cmpi ne, %1, %c0_i32_0 : i32
    scf.if %2 {
      %cst_20 = arith.constant 0.000000e+00 : f32
      %20 = vector.broadcast %cst_20 : f32 to vector<2x128x128xf32>
      %c0_21 = arith.constant 0 : index
      %c0_22 = arith.constant 0 : index
      %c0_23 = arith.constant 0 : index
      %21 = vector.load %arg8[%c0_21, %c0_22, %c0_23] : memref<2x128x128xf32, #tpu.memory_space<vmem>>, vector<2x128x128xf32>
      tpu.vector_store %arg8[%c0_21, %c0_22, %c0_23], %20 {strides = array<i32>} : memref<2x128x128xf32, #tpu.memory_space<vmem>>, vector<2x128x128xf32>,
      %cst_24 = arith.constant 0.000000e+00 : f32
      %22 = vector.broadcast %cst_24 : f32 to vector<2x128x1xf32>
      %c0_25 = arith.constant 0 : index
      %c0_26 = arith.constant 0 : index
      %c0_27 = arith.constant 0 : index
      %23 = vector.load %arg9[%c0_25, %c0_26, %c0_27] : memref<2x128x1xf32, #tpu.memory_space<vmem>>, vector<2x128x1xf32>
      tpu.vector_store %arg9[%c0_25, %c0_26, %c0_27], %22 {strides = array<i32>} : memref<2x128x1xf32, #tpu.memory_space<vmem>>, vector<2x128x1xf32>,
    } else {
    }
    %c0 = arith.constant 0 : index
    %c0_1 = arith.constant 0 : index
    %c0_2 = arith.constant 0 : index
    %3 = vector.load %arg3[%c0, %c0_1, %c0_2] : memref<2x128x128xf32, #tpu.memory_space<vmem>>, vector<2x128x128xf32>
    %c128_i32 = arith.constant 128 : i32
    %4 = arith.muli %arg2, %c128_i32 : i32
    %5 = tpu.assume_multiple %4, 128 : i32
    %c0_3 = arith.constant 0 : index
    %6 = arith.index_cast %5 : i32 to index
    %c0_4 = arith.constant 0 : index
    %7 = vector.load %arg4[%c0_3, %6, %c0_4] : memref<2x128x128xf32, #tpu.memory_space<vmem>>, vector<2x128x128xf32>
    %c0_5 = arith.constant 0 : index
    %c0_6 = arith.constant 0 : index
    %c0_7 = arith.constant 0 : index
    %8 = vector.load %arg8[%c0_5, %c0_6, %c0_7] : memref<2x128x128xf32, #tpu.memory_space<vmem>>, vector<2x128x128xf32>
    "tpu.trace_start"() <{level = 10 : i32, message = "bik,bkd->bid"}> : () -> ()
    %cst = arith.constant dense<0.000000e+00> : vector<2x128x128xf32>
    %9 = tpu.matmul %3, %7, %cst {dimension_numbers = #tpu.dot_dimension_numbers<[2], [1], [1], [2], [0, 0, 0, 1, 1, 2], [0], [0]>} : vector<2x128x128xf32>, vector<2x128x128xf32>, vector<2x128x128xf32> -> vector<2x128x128xf32>
    "tpu.trace_stop"() : () -> ()
    %10 = arith.addf %8, %9 : vector<2x128x128xf32>
    %c0_8 = arith.constant 0 : index
    %c0_9 = arith.constant 0 : index
    %c0_10 = arith.constant 0 : index
    %11 = vector.load %arg8[%c0_8, %c0_9, %c0_10] : memref<2x128x128xf32, #tpu.memory_space<vmem>>, vector<2x128x128xf32>
    tpu.vector_store %arg8[%c0_8, %c0_9, %c0_10], %10 {strides = array<i32>} : memref<2x128x128xf32, #tpu.memory_space<vmem>>, vector<2x128x128xf32>,
    %c0_11 = arith.constant 0 : index
    %c0_12 = arith.constant 0 : index
    %c0_13 = arith.constant 0 : index
    %12 = vector.load %arg9[%c0_11, %c0_12, %c0_13] : memref<2x128x1xf32, #tpu.memory_space<vmem>>, vector<2x128x1xf32>
    %cst_14 = arith.constant dense<0.000000e+00> : vector<2x128xf32>
    %13 = vector.multi_reduction <add>, %3, %cst_14 [2] : vector<2x128x128xf32> to vector<2x128xf32>
    %14 = vector.shape_cast %13 : vector<2x128xf32> to vector<2x128x1xf32>
    %15 = arith.addf %12, %14 : vector<2x128x1xf32>
    %c0_15 = arith.constant 0 : index
    %c0_16 = arith.constant 0 : index
    %c0_17 = arith.constant 0 : index
    %16 = vector.load %arg9[%c0_15, %c0_16, %c0_17] : memref<2x128x1xf32, #tpu.memory_space<vmem>>, vector<2x128x1xf32>
    tpu.vector_store %arg9[%c0_15, %c0_16, %c0_17], %15 {strides = array<i32>} : memref<2x128x1xf32, #tpu.memory_space<vmem>>, vector<2x128x1xf32>,
    %c0_i32_18 = arith.constant 0 : i32
    %17 = arith.cmpi eq, %arg2, %c0_i32_18 : i32
    %18 = arith.extui %17 : i1 to i32
    %c0_i32_19 = arith.constant 0 : i32
    %19 = arith.cmpi ne, %18, %c0_i32_19 : i32
    scf.if %19 {
      %c0_20 = arith.constant 0 : index
      %c0_21 = arith.constant 0 : index
      %c0_22 = arith.constant 0 : index
      %20 = vector.load %arg9[%c0_20, %c0_21, %c0_22] : memref<2x128x1xf32, #tpu.memory_space<vmem>>, vector<2x128x1xf32>
      %cst_23 = arith.constant 1.000000e+00 : f32
      %21 = vector.broadcast %cst_23 : f32 to vector<2x128x1xf32>
      %22 = arith.addf %20, %21 : vector<2x128x1xf32>
      %23 = tpu.reciprocal %22 : vector<2x128x1xf32> -> vector<2x128x1xf32>
      %c128_i32_24 = arith.constant 128 : i32
      %24 = arith.muli %arg1, %c128_i32_24 : i32
      %25 = tpu.assume_multiple %24, 128 : i32
      %c0_25 = arith.constant 0 : index
      %26 = arith.index_cast %25 : i32 to index
      %c0_26 = arith.constant 0 : index
      %27 = vector.load %arg4[%c0_25, %26, %c0_26] : memref<2x128x128xf32, #tpu.memory_space<vmem>>, vector<2x128x128xf32>
      %c0_27 = arith.constant 0 : index
      %c0_28 = arith.constant 0 : index
      %c0_29 = arith.constant 0 : index
      %28 = vector.load %arg8[%c0_27, %c0_28, %c0_29] : memref<2x128x128xf32, #tpu.memory_space<vmem>>, vector<2x128x128xf32>
      %29 = arith.addf %28, %27 : vector<2x128x128xf32>
      %30 = vector.broadcast %23 : vector<2x128x1xf32> to vector<2x128x128xf32>
      %31 = arith.mulf %29, %30 : vector<2x128x128xf32>
      %c0_30 = arith.constant 0 : index
      %c0_31 = arith.constant 0 : index
      %32 = vector.load %arg5[%c0_30, %c0_31] : memref<128x128xf32, #tpu.memory_space<vmem>>, vector<128x128xf32>
      "tpu.trace_start"() <{level = 10 : i32, message = "bid,de->bie"}> : () -> ()
      %cst_32 = arith.constant dense<0.000000e+00> : vector<2x128x128xf32>
      %33 = tpu.matmul %31, %32, %cst_32 {dimension_numbers = #tpu.dot_dimension_numbers<[2], [0], [0, 1], [1], [0, 0, 0, 1, 1, 1], [], []>} : vector<2x128x128xf32>, vector<128x128xf32>, vector<2x128x128xf32> -> vector<2x128x128xf32>
      "tpu.trace_stop"() : () -> ()
      %c0_33 = arith.constant 0 : index
      %c0_34 = arith.constant 0 : index
      %34 = vector.load %arg6[%c0_33, %c0_34] : memref<1x128xf32, #tpu.memory_space<vmem>>, vector<1x128xf32>
      %35 = vector.shape_cast %34 : vector<1x128xf32> to vector<1x1x128xf32>
      %36 = vector.broadcast %35 : vector<1x1x128xf32> to vector<2x128x128xf32>
      %37 = arith.addf %33, %36 : vector<2x128x128xf32>
      %cst_35 = arith.constant 0.000000e+00 : f32
      %38 = vector.broadcast %cst_35 : f32 to vector<2x128x128xf32>
      %39 = arith.maximumf %37, %38 : vector<2x128x128xf32>
      %c0_36 = arith.constant 0 : index
      %c0_37 = arith.constant 0 : index
      %c0_38 = arith.constant 0 : index
      %40 = vector.load %arg7[%c0_36, %c0_37, %c0_38] : memref<2x128x128xf32, #tpu.memory_space<vmem>>, vector<2x128x128xf32>
      tpu.vector_store %arg7[%c0_36, %c0_37, %c0_38], %39 {strides = array<i32>} : memref<2x128x128xf32, #tpu.memory_space<vmem>>, vector<2x128x128xf32>,
    } else {
    }
    return
  }
  func.func @transform_0(%arg0: i32, %arg1: i32, %arg2: i32) -> (i32, i32, i32) {
    %c0_i32 = arith.constant 0 : i32
    return %arg0, %arg1, %arg2 : i32, i32, i32
  }
  func.func @transform_1(%arg0: i32, %arg1: i32, %arg2: i32) -> (i32, i32, i32) {
    %c0_i32 = arith.constant 0 : i32
    %c0_i32_0 = arith.constant 0 : i32
    %c0_i32_1 = arith.constant 0 : i32
    return %arg0, %c0_i32, %c0_i32_0 : i32, i32, i32
  }
  func.func @transform_2(%arg0: i32, %arg1: i32, %arg2: i32) -> (i32, i32) {
    %c0_i32 = arith.constant 0 : i32
    %c0_i32_0 = arith.constant 0 : i32
    %c0_i32_1 = arith.constant 0 : i32
    return %c0_i32, %c0_i32_0 : i32, i32
  }
  func.func @transform_3(%arg0: i32, %arg1: i32, %arg2: i32) -> (i32, i32) {
    %c0_i32 = arith.constant 0 : i32
    %c0_i32_0 = arith.constant 0 : i32
    %c0_i32_1 = arith.constant 0 : i32
    return %c0_i32, %c0_i32_0 : i32, i32
  }
  func.func @transform_4(%arg0: i32, %arg1: i32, %arg2: i32) -> (i32, i32, i32) {
    %c0_i32 = arith.constant 0 : i32
    %c0_i32_0 = arith.constant 0 : i32
    return %arg0, %arg1, %c0_i32 : i32, i32, i32
  }
}

</mosaic_0001>

<bundles_post_ra>
// kernel: gcn_forward.2
= control target key start
LH: loop header
LB: loop body
LE: loop exit
PB: predicated region body
PF: predicated region fallthrough
CT: control target
= control target key end

     0   :  { %vm53_vm0 = vcmask 7168   ;;  %v1901_v2 = vmov 0.0   ;;  %v1902_v52 = vmov 0   ;;  %s2632_s0 = inlined_call_operand.vmem [shape: f32[2,128,128], index: 0, kind: input, shape index: {}]   ;;  %s2633_s1 = inlined_call_operand.vmem [shape: f32[2,128,128], index: 1, kind: input, shape index: {}]   ;;  %s2634_s2 = inlined_call_operand.vmem [shape: f32[128,128], index: 2, kind: input, shape index: {}]   ;;  %s2635_s3 = inlined_call_operand.vmem [shape: f32[1,128], index: 3, kind: input, shape index: {}]   ;;  %s2636_s4 = inlined_call_operand.vmem [shape: f32[2,128,128], index: 4, kind: output, shape index: {}]  }
   0x1   :  { %v1931_v0 = vld [vmem:[%s2632_s0 + $0x10] sm:$0xff]  ;;  %v86_v1 = vld [vmem:[%s2632_s0] sm:$0xff]  ;;  %56 = vst.msk [vmem:[#allocation3 + $0x10] sm:$0xff] %vm53_vm0, %v1901_v2  ;;  %54 = vst.msk [vmem:[#allocation3] sm:$0xff] %vm53_vm0, %v1901_v2  ;;  %1807 = vset.pattern.permute.xlu0 %v1902_v52  ;;  %1808 = vset.pattern.permute.xlu1 %v1902_v52 }
   0x2   :  { %55 = vst.msk [vmem:[#allocation3 + $0x8] sm:$0xff] %vm53_vm0, %v1901_v2  ;;  %57 = vst.msk [vmem:[#allocation3 + $0x18] sm:$0xff] %vm53_vm0, %v1901_v2  ;;  %574 = vadd.xlane.f32.xlu1 %v1931_v0  ;;  %570 = vadd.xlane.f32.xlu0 %v86_v1  ;;  %v1972_v3 = vld [vmem:[%s2632_s0 + $0x18] sm:$0xff]  ;;  %v1977_v4 = vld [vmem:[%s2632_s0 + $0x8] sm:$0xff] }
   0x3   :  { %58 = vst.msk [vmem:[#allocation3 + $0x20] sm:$0xff] %vm53_vm0, %v1901_v2  ;;  %59 = vst.msk [vmem:[#allocation3 + $0x28] sm:$0xff] %vm53_vm0, %v1901_v2  ;;  %1549 = vmatprep.mubr.f32.mxu1 %v86_v1  ;;  %v1984_v5 = vld [vmem:[%s2632_s0 + $0x28] sm:$0xff]  ;;  %v1989_v6 = vld [vmem:[%s2632_s0 + $0x20] sm:$0xff] }
   0x4   :  { %60 = vst.msk [vmem:[#allocation3 + $0x30] sm:$0xff] %vm53_vm0, %v1901_v2  ;;  %61 = vst.msk [vmem:[#allocation3 + $0x38] sm:$0xff] %vm53_vm0, %v1901_v2  ;;  %v120_v7 = vld [vmem:[%s2633_s1] sm:$0xff]  ;;  %v121_v8 = vld [vmem:[%s2633_s1 + $0x8] sm:$0xff] }
   0x5   :  { %62 = vst.msk [vmem:[#allocation3 + $0x40] sm:$0xff] %vm53_vm0, %v1901_v2  ;;  %63 = vst.msk [vmem:[#allocation3 + $0x48] sm:$0xff] %vm53_vm0, %v1901_v2  ;;  %v1709_v9 = vpack.c.bf16 %v121_v8, %v120_v7  ;;  %v122_v10 = vld [vmem:[%s2633_s1 + $0x10] sm:$0xff]  ;;  %v123_v11 = vld [vmem:[%s2633_s1 + $0x18] sm:$0xff] }
   0x6   :  { %64 = vst.msk [vmem:[#allocation3 + $0x50] sm:$0xff] %vm53_vm0, %v1901_v2  ;;  %65 = vst.msk [vmem:[#allocation3 + $0x58] sm:$0xff] %vm53_vm0, %v1901_v2  ;;  %576 = vadd.xlane.f32.xlu1 %v1972_v3  ;;  %572 = vadd.xlane.f32.xlu0 %v1977_v4  ;;  %v1713_v12 = vpack.c.bf16 %v123_v11, %v122_v10  ;;  %v124_v13 = vld [vmem:[%s2633_s1 + $0x20] sm:$0xff]  ;;  %v125_v14 = vld [vmem:[%s2633_s1 + $0x28] sm:$0xff] }
   0x7   :  { %66 = vst.msk [vmem:[#allocation3 + $0x60] sm:$0xff] %vm53_vm0, %v1901_v2  ;;  %67 = vst.msk [vmem:[#allocation3 + $0x68] sm:$0xff] %vm53_vm0, %v1901_v2  ;;  %v2014_v15 = vld [vmem:[%s2632_s0 + $0x38] sm:$0xff]  ;;  %v2019_v16 = vld [vmem:[%s2632_s0 + $0x30] sm:$0xff]  ;;  %1710 = vmatprep.subr.bf16.mxu1 %v1709_v9  ;;  %v1717_v17 = vpack.c.bf16 %v125_v14, %v124_v13 }
   0x8   :  { %68 = vst.msk [vmem:[#allocation3 + $0x70] sm:$0xff] %vm53_vm0, %v1901_v2  ;;  %69 = vst.msk [vmem:[#allocation3 + $0x78] sm:$0xff] %vm53_vm0, %v1901_v2  ;;  %1712 = vmatpush3.bf16.msra.mxu1 %v1709_v9  ;;  %v126_v18 = vld [vmem:[%s2633_s1 + $0x30] sm:$0xff]  ;;  %v127_v19 = vld [vmem:[%s2633_s1 + $0x38] sm:$0xff] }
   0x9   :  { %70 = vst.msk [vmem:[#allocation3 + $0x80] sm:$0xff] %vm53_vm0, %v1901_v2  ;;  %71 = vst.msk [vmem:[#allocation3 + $0x88] sm:$0xff] %vm53_vm0, %v1901_v2  ;;  %1714 = vmatprep.subr.bf16.mxu1 %v1713_v12  ;;  %v2032_v20 = vld [vmem:[%s2632_s0 + $0x48] sm:$0xff]  ;;  %v2037_v21 = vld [vmem:[%s2632_s0 + $0x40] sm:$0xff]  ;;  %v1721_v22 = vpack.c.bf16 %v127_v19, %v126_v18 }
   0xa   :  { %72 = vst.msk [vmem:[#allocation3 + $0x90] sm:$0xff] %vm53_vm0, %v1901_v2  ;;  %73 = vst.msk [vmem:[#allocation3 + $0x98] sm:$0xff] %vm53_vm0, %v1901_v2  ;;  %580 = vadd.xlane.f32.xlu1 %v1984_v5  ;;  %578 = vadd.xlane.f32.xlu0 %v1989_v6  ;;  %v128_v23 = vld [vmem:[%s2633_s1 + $0x40] sm:$0xff]  ;;  %v129_v24 = vld [vmem:[%s2633_s1 + $0x48] sm:$0xff] }
   0xb   :  { %74 = vst.msk [vmem:[#allocation3 + $0xa0] sm:$0xff] %vm53_vm0, %v1901_v2  ;;  %75 = vst.msk [vmem:[#allocation3 + $0xa8] sm:$0xff] %vm53_vm0, %v1901_v2  ;;  %v2050_v25 = vld [vmem:[%s2632_s0 + $0x58] sm:$0xff]  ;;  %v2055_v26 = vld [vmem:[%s2632_s0 + $0x50] sm:$0xff]  ;;  %v1725_v27 = vpack.c.bf16 %v129_v24, %v128_v23 }
   0xc   :  { %76 = vst.msk [vmem:[#allocation3 + $0xb0] sm:$0xff] %vm53_vm0, %v1901_v2  ;;  %77 = vst.msk [vmem:[#allocation3 + $0xb8] sm:$0xff] %vm53_vm0, %v1901_v2  ;;  %1716 = vmatpush3.bf16.msra.mxu1 %v1713_v12  ;;  %v130_v28 = vld [vmem:[%s2633_s1 + $0x50] sm:$0xff]  ;;  %v131_v29 = vld [vmem:[%s2633_s1 + $0x58] sm:$0xff] }
   0xd   :  { %78 = vst.msk [vmem:[#allocation3 + $0xc0] sm:$0xff] %vm53_vm0, %v1901_v2  ;;  %79 = vst.msk [vmem:[#allocation3 + $0xc8] sm:$0xff] %vm53_vm0, %v1901_v2  ;;  %1718 = vmatprep.subr.bf16.mxu1 %v1717_v17  ;;  %v2068_v30 = vld [vmem:[%s2632_s0 + $0x68] sm:$0xff]  ;;  %v2073_v31 = vld [vmem:[%s2632_s0 + $0x60] sm:$0xff]  ;;  %v1729_v32 = vpack.c.bf16 %v131_v29, %v130_v28 }
   0xe   :  { %80 = vst.msk [vmem:[#allocation3 + $0xd0] sm:$0xff] %vm53_vm0, %v1901_v2  ;;  %81 = vst.msk [vmem:[#allocation3 + $0xd8] sm:$0xff] %vm53_vm0, %v1901_v2  ;;  %584 = vadd.xlane.f32.xlu1 %v2014_v15  ;;  %582 = vadd.xlane.f32.xlu0 %v2019_v16  ;;  %v132_v33 = vld [vmem:[%s2633_s1 + $0x60] sm:$0xff]  ;;  %v133_v34 = vld [vmem:[%s2633_s1 + $0x68] sm:$0xff] }
   0xf   :  { %82 = vst.msk [vmem:[#allocation3 + $0xe0] sm:$0xff] %vm53_vm0, %v1901_v2  ;;  %83 = vst.msk [vmem:[#allocation3 + $0xe8] sm:$0xff] %vm53_vm0, %v1901_v2  ;;  %v2086_v35 = vld [vmem:[%s2632_s0 + $0x78] sm:$0xff]  ;;  %v2091_v36 = vld [vmem:[%s2632_s0 + $0x70] sm:$0xff]  ;;  %v1733_v37 = vpack.c.bf16 %v133_v34, %v132_v33 }
  0x10   :  { %84 = vst.msk [vmem:[#allocation3 + $0xf0] sm:$0xff] %vm53_vm0, %v1901_v2  ;;  %85 = vst.msk [vmem:[#allocation3 + $0xf8] sm:$0xff] %vm53_vm0, %v1901_v2  ;;  %1720 = vmatpush3.bf16.msra.mxu1 %v1717_v17  ;;  %v134_v38 = vld [vmem:[%s2633_s1 + $0x70] sm:$0xff]  ;;  %v135_v39 = vld [vmem:[%s2633_s1 + $0x78] sm:$0xff] }
  0x11   :  { %1722 = vmatprep.subr.bf16.mxu1 %v1721_v22  ;;  %v2104_v40 = vld [vmem:[%s2632_s0 + $0x88] sm:$0xff]  ;;  %v2109_v41 = vld [vmem:[%s2632_s0 + $0x80] sm:$0xff]  ;;  %v1737_v42 = vpack.c.bf16 %v135_v39, %v134_v38  ;;  %v2122_v45 = vld [vmem:[%s2632_s0 + $0x98] sm:$0xff] }
  0x12   :  { %588 = vadd.xlane.f32.xlu1 %v2032_v20  ;;  %586 = vadd.xlane.f32.xlu0 %v2037_v21  ;;  %v136_v43 = vld [vmem:[%s2633_s1 + $0x80] sm:$0xff]  ;;  %v137_v44 = vld [vmem:[%s2633_s1 + $0x88] sm:$0xff]  ;;  %v2127_v46 = vld [vmem:[%s2632_s0 + $0x90] sm:$0xff] }
  0x13   :  { %v1741_v47 = vpack.c.bf16 %v137_v44, %v136_v43  ;;  %v138_v48 = vld [vmem:[%s2633_s1 + $0x90] sm:$0xff]  ;;  %v139_v49 = vld [vmem:[%s2633_s1 + $0x98] sm:$0xff]  ;;  %v2140_v50 = vld [vmem:[%s2632_s0 + $0xa8] sm:$0xff] }
  0x14   :  { %1724 = vmatpush3.bf16.msra.mxu1 %v1721_v22  ;;  %v2145_v51 = vld [vmem:[%s2632_s0 + $0xa0] sm:$0xff]  ;;  %v1745_v53 = vpack.c.bf16 %v139_v49, %v138_v48  ;;  %v141_v55 = vld [vmem:[%s2633_s1 + $0xa8] sm:$0xff]  ;;  %v2158_v56 = vld [vmem:[%s2632_s0 + $0xb8] sm:$0xff] }
  0x15   :  { %1726 = vmatprep.subr.bf16.mxu1 %v1725_v27  ;;  %v140_v54 = vld [vmem:[%s2633_s1 + $0xa0] sm:$0xff]  ;;  %v2163_v57 = vld [vmem:[%s2632_s0 + $0xb0] sm:$0xff]  ;;  %v143_v60 = vld [vmem:[%s2633_s1 + $0xb8] sm:$0xff] }
  0x16   :  { %592 = vadd.xlane.f32.xlu1 %v2050_v25  ;;  %590 = vadd.xlane.f32.xlu0 %v2055_v26  ;;  %v1749_v58 = vpack.c.bf16 %v141_v55, %v140_v54  ;;  %v142_v59 = vld [vmem:[%s2633_s1 + $0xb0] sm:$0xff]  ;;  %v2178_v61 = vld [vmem:[%s2632_s0 + $0xc8] sm:$0xff]  ;;  %v110_v62 = vld [vmem:[%s2632_s0 + $0xc0] sm:$0xff] }
  0x17   :  { %v1753_v63 = vpack.c.bf16 %v143_v60, %v142_v59  ;;  %v145_v1 = vld [vmem:[%s2633_s1 + $0xc8] sm:$0xff]  ;;  %v113_v2 = vld [vmem:[%s2632_s0 + $0xd8] sm:$0xff]  ;;  %v148_v10 = vld [vmem:[%s2633_s1 + $0xe0] sm:$0xff] }
  0x18   :  { %1728 = vmatpush3.bf16.msra.mxu1 %v1725_v27  ;;  %v147_v7 = vld [vmem:[%s2633_s1 + $0xd8] sm:$0xff]  ;;  %v115_v8 = vld [vmem:[%s2632_s0 + $0xe8] sm:$0xff]  ;;  %v116_v13 = vld [vmem:[%s2632_s0 + $0xf0] sm:$0xff] }
  0x19   :  { %1730 = vmatprep.subr.bf16.mxu1 %v1729_v32  ;;  %v149_v11 = vld [vmem:[%s2633_s1 + $0xe8] sm:$0xff]  ;;  %v117_v12 = vld [vmem:[%s2632_s0 + $0xf8] sm:$0xff]  ;;  %v1088_v18 = vld [vmem:[%s2634_s2] sm:$0xff] }
  0x1a   :  { %596 = vadd.xlane.f32.xlu1 %v2068_v30  ;;  %594 = vadd.xlane.f32.xlu0 %v2073_v31  ;;  %v1765_v14 = vpack.c.bf16 %v149_v11, %v148_v10  ;;  %v1089_v19 = vld [vmem:[%s2634_s2 + $0x8] sm:$0xff]  ;;  %v1091_v22 = vld [vmem:[%s2634_s2 + $0x18] sm:$0xff]  ;;  %v1092_v24 = vld [vmem:[%s2634_s2 + $0x20] sm:$0xff] }
  0x1b   :  { %v1094_v27 = vld [vmem:[%s2634_s2 + $0x30] sm:$0xff]  ;;  %v1095_v28 = vld [vmem:[%s2634_s2 + $0x38] sm:$0xff]  ;;  %v542_v52 = vld [vmem:[#allocation3 + $0x20] sm:$0xff] }
  0x1c   :  { %1732 = vmatpush3.bf16.msra.mxu1 %v1729_v32  ;;  %v1785_v29 = vpack.c.bf16 %v1095_v28, %v1094_v27  ;;  %v1098_v33 = vld [vmem:[%s2634_s2 + $0x50] sm:$0xff]  ;;  %v1099_v34 = vld [vmem:[%s2634_s2 + $0x58] sm:$0xff] }
  0x1d   :  { %1734 = vmatprep.subr.bf16.mxu1 %v1733_v37  ;;  %v540_v39 = vld [vmem:[#allocation3 + $0x10] sm:$0xff] }
  0x1e   :  { %600 = vadd.xlane.f32.xlu1 %v2086_v35  ;;  %598 = vadd.xlane.f32.xlu0 %v2091_v36  ;;  %v544_v59 = vld [vmem:[#allocation3 + $0x30] sm:$0xff] }
  0x20   :  { %1736 = vmatpush3.bf16.msra.mxu1 %v1733_v37  ;;  %v1101_v37 = vld [vmem:[%s2634_s2 + $0x68] sm:$0xff] }
  0x21   :  { %1738 = vmatprep.subr.bf16.mxu1 %v1737_v42 }
  0x22   :  { %604 = vadd.xlane.f32.xlu1 %v2104_v40  ;;  %602 = vadd.xlane.f32.xlu0 %v2109_v41 }
  0x24   :  { %1740 = vmatpush3.bf16.msra.mxu1 %v1737_v42 }
  0x25   :  { %1742 = vmatprep.subr.bf16.mxu1 %v1741_v47 }
  0x26   :  { %608 = vadd.xlane.f32.xlu1 %v2122_v45  ;;  %606 = vadd.xlane.f32.xlu0 %v2127_v46 }
  0x27   :  { %1550 = vmatmul.mubr.f32.vlgmr.msra.gmra.mrb[0].mxu1 %v1977_v4 }
  0x28   :  { %1744 = vmatpush3.bf16.msra.mxu1 %v1741_v47  ;;  %1552 = vmatprep.mubr.f32.mxu1 %v1931_v0  ;;  %v144_v0 = vld [vmem:[%s2633_s1 + $0xc0] sm:$0xff] }
  0x29   :  { %1746 = vmatprep.subr.bf16.mxu1 %v1745_v53  ;;  %v1757_v4 = vpack.c.bf16 %v145_v1, %v144_v0 }
  0x2a   :  { %612 = vadd.xlane.f32.xlu1 %v2140_v50  ;;  %610 = vadd.xlane.f32.xlu0 %v2145_v51 }
  0x2b   :  { %1553 = vmatmul.mubr.f32.gmra.mrb[2].mxu1 %v1972_v3  ;;  %v112_v3 = vld [vmem:[%s2632_s0 + $0xd0] sm:$0xff] }
  0x2c   :  { %1748 = vmatpush3.bf16.msra.mxu1 %v1745_v53  ;;  %1555 = vmatprep.mubr.f32.mxu1 %v1989_v6  ;;  %v146_v6 = vld [vmem:[%s2633_s1 + $0xd0] sm:$0xff] }
  0x2d   :  { %1750 = vmatprep.subr.bf16.mxu1 %v1749_v58  ;;  %v1761_v9 = vpack.c.bf16 %v147_v7, %v146_v6 }
  0x2e   :  { %616 = vadd.xlane.f32.xlu1 %v2158_v56  ;;  %614 = vadd.xlane.f32.xlu0 %v2163_v57 }
  0x2f   :  { %1556 = vmatmul.mubr.f32.gmra.mrb[4].mxu1 %v1984_v5  ;;  %v114_v5 = vld [vmem:[%s2632_s0 + $0xe0] sm:$0xff] }
  0x30   :  { %1752 = vmatpush3.bf16.msra.mxu1 %v1749_v58  ;;  %1558 = vmatprep.mubr.f32.mxu1 %v2019_v16  ;;  %v151_v16 = vld [vmem:[%s2633_s1 + $0xf8] sm:$0xff] }
  0x31   :  { %1754 = vmatprep.subr.bf16.mxu1 %v1753_v63 }
  0x32   :  { %620 = vadd.xlane.f32.xlu1 %v2178_v61  ;;  %618 = vadd.xlane.f32.xlu0 %v110_v62 }
  0x33   :  { %1559 = vmatmul.mubr.f32.gmra.mrb[6].mxu1 %v2014_v15  ;;  %v150_v15 = vld [vmem:[%s2633_s1 + $0xf0] sm:$0xff] }
  0x34   :  { %1756 = vmatpush3.bf16.msra.mxu1 %v1753_v63  ;;  %1561 = vmatprep.mubr.f32.mxu1 %v2037_v21  ;;  %v1769_v17 = vpack.c.bf16 %v151_v16, %v150_v15  ;;  %v1773_v21 = vpack.c.bf16 %v1089_v19, %v1088_v18 }
  0x35   :  { %1758 = vmatprep.subr.bf16.mxu1 %v1757_v4 }
  0x36   :  { %624 = vadd.xlane.f32.xlu1 %v113_v2  ;;  %622 = vadd.xlane.f32.xlu0 %v112_v3 }
  0x37   :  { %1562 = vmatmul.mubr.f32.gmra.mrb[8].mxu1 %v2032_v20  ;;  %v1090_v20 = vld [vmem:[%s2634_s2 + $0x10] sm:$0xff]  ;;  %1774 = vmatprep.subr.bf16.mxu0 %v1773_v21 }
  0x38   :  { %1760 = vmatpush3.bf16.msra.mxu1 %v1757_v4  ;;  %1564 = vmatprep.mubr.f32.mxu1 %v2055_v26  ;;  %v1777_v23 = vpack.c.bf16 %v1091_v22, %v1090_v20  ;;  %v546_v4 = vld [vmem:[#allocation3 + $0x40] sm:$0xff]  ;;  %v551_v20 = vld [vmem:[#allocation3 + $0x68] sm:$0xff] }
  0x39   :  { %1762 = vmatprep.subr.bf16.mxu1 %v1761_v9  ;;  %1776 = vmatpush3.bf16.msra.mxu0 %v1773_v21  ;;  %v550_v21 = vld [vmem:[#allocation3 + $0x60] sm:$0xff] }
  0x3a   :  { %628 = vadd.xlane.f32.xlu1 %v115_v8  ;;  %626 = vadd.xlane.f32.xlu0 %v114_v5 }
  0x3b   :  { %1565 = vmatmul.mubr.f32.gmra.mrb[10].mxu1 %v2050_v25  ;;  %v1093_v25 = vld [vmem:[%s2634_s2 + $0x28] sm:$0xff]  ;;  %1778 = vmatprep.subr.bf16.mxu0 %v1777_v23 }
  0x3c   :  { %1764 = vmatpush3.bf16.msra.mxu1 %v1761_v9  ;;  %1567 = vmatprep.mubr.f32.mxu1 %v2073_v31  ;;  %v1781_v26 = vpack.c.bf16 %v1093_v25, %v1092_v24  ;;  %v1097_v31 = vld [vmem:[%s2634_s2 + $0x48] sm:$0xff]  ;;  %v1102_v24 = vld [vmem:[%s2634_s2 + $0x70] sm:$0xff]  ;;  %v1103_v25 = vld [vmem:[%s2634_s2 + $0x78] sm:$0xff] }
  0x3d   :  { %1766 = vmatprep.subr.bf16.mxu1 %v1765_v14  ;;  %1780 = vmatpush3.bf16.msra.mxu0 %v1777_v23 }
  0x3e   :  { %632 = vadd.xlane.f32.xlu1 %v117_v12  ;;  %630 = vadd.xlane.f32.xlu0 %v116_v13 }
  0x3f   :  { %1568 = vmatmul.mubr.f32.gmra.mrb[12].mxu1 %v2068_v30  ;;  %1782 = vmatprep.subr.bf16.mxu0 %v1781_v26  ;;  %v1096_v30 = vld [vmem:[%s2634_s2 + $0x40] sm:$0xff] }
  0x40   :  { %1768 = vmatpush3.bf16.msra.mxu1 %v1765_v14  ;;  %1570 = vmatprep.mubr.f32.mxu1 %v2091_v36  ;;  %v1789_v32 = vpack.c.bf16 %v1097_v31, %v1096_v30  ;;  %v1100_v36 = vld [vmem:[%s2634_s2 + $0x60] sm:$0xff] }
  0x41   :  { %1770 = vmatprep.subr.bf16.mxu1 %v1769_v17  ;;  %1784 = vmatpush3.bf16.msra.mxu0 %v1781_v26  ;;  %v1797_v38 = vpack.c.bf16 %v1101_v37, %v1100_v36 }
  0x42   :  { %1786 = vmatprep.subr.bf16.mxu0 %v1785_v29 }
  0x43   :  { %1571 = vmatmul.mubr.f32.gmra.mrb[14].mxu1 %v2086_v35  ;;  %v1793_v35 = vpack.c.bf16 %v1099_v34, %v1098_v33  ;;  %v552_v34 = vld [vmem:[#allocation3 + $0x70] sm:$0xff] }
  0x44   :  { %1772 = vmatpush3.bf16.msra.mxu1 %v1769_v17  ;;  %1605 = vmatprep.mubr.f32.mxu1 %v2109_v41 }
  0x45   :  { %1788 = vmatpush3.bf16.msra.mxu0 %v1785_v29  ;;  %v1801_v29 = vpack.c.bf16 %v1103_v25, %v1102_v24 }
  0x46   :  { %1790 = vmatprep.subr.bf16.mxu0 %v1789_v32 }
  0x47   :  { %1606 = vmatmul.mubr.f32.vlgmr.msra.gmra.mrb[16].mxu1 %v2104_v40  ;;  %v538_v40 = vld [vmem:[#allocation3] sm:$0xff] }
  0x48   :  { %1608 = vmatprep.mubr.f32.mxu1 %v2127_v46  ;;  %v539_v46 = vld [vmem:[#allocation3 + $0x8] sm:$0xff] }
  0x49   :  { %1792 = vmatpush3.bf16.msra.mxu0 %v1789_v32  ;;  %v553_v32 = vld [vmem:[#allocation3 + $0x78] sm:$0xff] }
  0x4a   :  { %1794 = vmatprep.subr.bf16.mxu0 %v1793_v35 }
  0x4b   :  { %1609 = vmatmul.mubr.f32.gmra.mrb[18].mxu1 %v2122_v45  ;;  %v541_v45 = vld [vmem:[#allocation3 + $0x18] sm:$0xff] }
  0x4c   :  { %1611 = vmatprep.mubr.f32.mxu1 %v2145_v51  ;;  %v543_v51 = vld [vmem:[#allocation3 + $0x28] sm:$0xff] }
  0x4d   :  { %1796 = vmatpush3.bf16.msra.mxu0 %v1793_v35 }
  0x4e   :  { %1798 = vmatprep.subr.bf16.mxu0 %v1797_v38 }
  0x4f   :  { %1612 = vmatmul.mubr.f32.gmra.mrb[20].mxu1 %v2140_v50 }
  0x50   :  { %1614 = vmatprep.mubr.f32.mxu1 %v2163_v57  ;;  %v545_v57 = vld [vmem:[#allocation3 + $0x38] sm:$0xff] }
  0x51   :  { %1800 = vmatpush3.bf16.msra.mxu0 %v1797_v38 }
  0x52   :  { %1802 = vmatprep.subr.bf16.mxu0 %v1801_v29 }
  0x53   :  { %1615 = vmatmul.mubr.f32.gmra.mrb[22].mxu1 %v2158_v56 }
  0x54   :  { %1617 = vmatprep.mubr.f32.mxu1 %v110_v62 }
  0x55   :  { %1804 = vmatpush3.bf16.msra.mxu0 %v1801_v29 }
  0x57   :  { %1618 = vmatmul.mubr.f32.gmra.mrb[24].mxu1 %v2178_v61 }
  0x58   :  { %1620 = vmatprep.mubr.f32.mxu1 %v112_v3 }
  0x5b   :  { %1621 = vmatmul.mubr.f32.gmra.mrb[26].mxu1 %v113_v2  ;;  %v547_v2 = vld [vmem:[#allocation3 + $0x48] sm:$0xff] }
  0x5c   :  { %1623 = vmatprep.mubr.f32.mxu1 %v114_v5 }
  0x5f   :  { %1624 = vmatmul.mubr.f32.gmra.mrb[28].mxu1 %v115_v8 }
  0x60   :  { %1626 = vmatprep.mubr.f32.mxu1 %v116_v13  ;;  %v548_v13 = vld [vmem:[#allocation3 + $0x50] sm:$0xff] }
  0x63   :  { %1627 = vmatmul.mubr.f32.gmra.mrb[30].mxu1 %v117_v12  ;;  %v549_v12 = vld [vmem:[#allocation3 + $0x58] sm:$0xff] }
  0x8f   :  { %v575_v41 = vpop.xlane.xlu1 %574  ;;  %v571_v42 = vpop.xlane.xlu0 %570 }
  0x90   :  { %v636_v43 = vadd.f32 %v575_v41, %v540_v39  ;;  %v634_v44 = vadd.f32 %v571_v42, %v538_v40 }
  0x92   :  { %669 = vst.msk [vmem:[#allocation3 + $0x10] sm:$0xff] %vm53_vm0, %v636_v43  ;;  %667 = vst.msk [vmem:[#allocation3] sm:$0xff] %vm53_vm0, %v634_v44  ;;  %v555_v44 = vld [vmem:[#allocation3 + $0x88] sm:$0xff] }
  0x93   :  { %v577_v47 = vpop.xlane.xlu1 %576  ;;  %v573_v48 = vpop.xlane.xlu0 %572 }
  0x94   :  { %v637_v49 = vadd.f32 %v577_v47, %v541_v45  ;;  %v635_v50 = vadd.f32 %v573_v48, %v539_v46  ;;  %v554_v46 = vld [vmem:[#allocation3 + $0x80] sm:$0xff] }
  0x96   :  { %670 = vst.msk [vmem:[#allocation3 + $0x18] sm:$0xff] %vm53_vm0, %v637_v49  ;;  %668 = vst.msk [vmem:[#allocation3 + $0x8] sm:$0xff] %vm53_vm0, %v635_v50 }
  0x97   :  { %v581_v53 = vpop.xlane.xlu1 %580  ;;  %v579_v54 = vpop.xlane.xlu0 %578 }
  0x98   :  { %v639_v55 = vadd.f32 %v581_v53, %v543_v51  ;;  %v638_v56 = vadd.f32 %v579_v54, %v542_v52 }
  0x99   :  { %v702_v58 = vld [vmem:[#allocation3] sm:$0xff]  ;;  %v704_v63 = vld [vmem:[#allocation3 + $0x10] sm:$0xff] }
  0x9a   :  { %672 = vst.msk [vmem:[#allocation3 + $0x28] sm:$0xff] %vm53_vm0, %v639_v55  ;;  %671 = vst.msk [vmem:[#allocation3 + $0x20] sm:$0xff] %vm53_vm0, %v638_v56  ;;  %v734_v60 = vadd.f32 1.0, %v702_v58  ;;  %v736_v7 = vadd.f32 1.0, %v704_v63  ;;  %v557_v55 = vld [vmem:[#allocation3 + $0x98] sm:$0xff] }
  0x9b   :  { %v585_v61 = vpop.xlane.xlu1 %584  ;;  %v583_v62 = vpop.xlane.xlu0 %582 }
  0x9c   :  { %v641_v0 = vadd.f32 %v585_v61, %v545_v57  ;;  %1809 = vrcp.f32 %v734_v60  ;;  %v640_v1 = vadd.f32 %v583_v62, %v544_v59  ;;  %v556_v57 = vld [vmem:[#allocation3 + $0x90] sm:$0xff] }
  0x9d   :  { %v703_v3 = vld [vmem:[#allocation3 + $0x8] sm:$0xff]  ;;  %v705_v9 = vld [vmem:[#allocation3 + $0x18] sm:$0xff] }
  0x9e   :  { %674 = vst.msk [vmem:[#allocation3 + $0x38] sm:$0xff] %vm53_vm0, %v641_v0  ;;  %673 = vst.msk [vmem:[#allocation3 + $0x30] sm:$0xff] %vm53_vm0, %v640_v1  ;;  %v735_v6 = vadd.f32 1.0, %v703_v3  ;;  %v737_v14 = vadd.f32 1.0, %v705_v9 }
  0x9f   :  { %v589_v8 = vpop.xlane.xlu1 %588  ;;  %v587_v5 = vpop.xlane.xlu0 %586 }
  0xa0   :  { %v643_v10 = vadd.f32 %v589_v8, %v547_v2  ;;  %1811 = vrcp.f32 %v735_v6  ;;  %v642_v11 = vadd.f32 %v587_v5, %v546_v4  ;;  %v559_v2 = vld [vmem:[#allocation3 + $0xa8] sm:$0xff]  ;;  %v558_v4 = vld [vmem:[#allocation3 + $0xa0] sm:$0xff] }
  0xa1   :  { %1813 = vrcp.f32 %v736_v7  ;;  %v706_v17 = vld [vmem:[#allocation3 + $0x20] sm:$0xff]  ;;  %v707_v28 = vld [vmem:[#allocation3 + $0x28] sm:$0xff] }
  0xa2   :  { %676 = vst.msk [vmem:[#allocation3 + $0x48] sm:$0xff] %vm53_vm0, %v643_v10  ;;  %675 = vst.msk [vmem:[#allocation3 + $0x40] sm:$0xff] %vm53_vm0, %v642_v11  ;;  %1815 = vrcp.f32 %v737_v14  ;;  %v738_v23 = vadd.f32 1.0, %v706_v17  ;;  %v739_v37 = vadd.f32 1.0, %v707_v28  ;;  %v561_v14 = vld [vmem:[#allocation3 + $0xb8] sm:$0xff]  ;;  %v562_v28 = vld [vmem:[#allocation3 + $0xc0] sm:$0xff] }
  0xa3   :  { %v593_v15 = vpop.xlane.xlu1 %592  ;;  %v591_v16 = vpop.xlane.xlu0 %590 }
  0xa4   :  { %v645_v18 = vadd.f32 %v593_v15, %v549_v12  ;;  %v644_v19 = vadd.f32 %v591_v16, %v548_v13  ;;  %1817 = vrcp.f32 %v738_v23  ;;  %v560_v16 = vld [vmem:[#allocation3 + $0xb0] sm:$0xff] }
  0xa5   :  { %v708_v40 = vld [vmem:[#allocation3 + $0x30] sm:$0xff]  ;;  %v709_v51 = vld [vmem:[#allocation3 + $0x38] sm:$0xff] }
  0xa6   :  { %v1810_v22 = vpop.eup %1809  ;;  %678 = vst.msk [vmem:[#allocation3 + $0x58] sm:$0xff] %vm53_vm0, %v645_v18  ;;  %677 = vst.msk [vmem:[#allocation3 + $0x50] sm:$0xff] %vm53_vm0, %v644_v19  ;;  %v740_v48 = vadd.f32 1.0, %v708_v40  ;;  %v741_v59 = vadd.f32 1.0, %v709_v51  ;;  %v564_v40 = vld [vmem:[#allocation3 + $0xd0] sm:$0xff] }
  0xa7   :  { %v597_v26 = vpop.xlane.xlu1 %596  ;;  %898 = vperm.xlu0 %1807, %v1810_v22   ;;  %v595_v27 = vpop.xlane.xlu0 %594 }
  0xa8   :  { %v647_v30 = vadd.f32 %v597_v26, %v551_v20  ;;  %v646_v31 = vadd.f32 %v595_v27, %v550_v21  ;;  %v563_v26 = vld [vmem:[#allocation3 + $0xc8] sm:$0xff] }
  0xa9   :  { %v711_v33 = vld [vmem:[#allocation3 + $0x48] sm:$0xff]  ;;  %v710_v62 = vld [vmem:[#allocation3 + $0x40] sm:$0xff] }
  0xaa   :  { %v1812_v35 = vpop.eup %1811  ;;  %680 = vst.msk [vmem:[#allocation3 + $0x68] sm:$0xff] %vm53_vm0, %v647_v30  ;;  %v743_v36 = vadd.f32 1.0, %v711_v33  ;;  %679 = vst.msk [vmem:[#allocation3 + $0x60] sm:$0xff] %vm53_vm0, %v646_v31  ;;  %v742_v8 = vadd.f32 1.0, %v710_v62  ;;  %v569_v62 = vld [vmem:[#allocation3 + $0xf8] sm:$0xff] }
  0xab   :  { %v601_v38 = vpop.xlane.xlu1 %600  ;;  %903 = vperm.xlu1 %1808, %v1812_v35   ;;  %v599_v39 = vpop.xlane.xlu0 %598 }
  0xac   :  { %v1814_v41 = vpop.eup %1813  ;;  %v649_v42 = vadd.f32 %v601_v38, %v553_v32  ;;  %1819 = vrcp.f32 %v743_v36  ;;  %v648_v43 = vadd.f32 %v599_v39, %v552_v34  ;;  %v565_v38 = vld [vmem:[#allocation3 + $0xd8] sm:$0xff] }
  0xad   :  { %v713_v45 = vld [vmem:[#allocation3 + $0x58] sm:$0xff]  ;;  %1821 = vrcp.f32 %v739_v37  ;;  %v1816_v52 = vpop.eup %1815  ;;  %v712_v10 = vld [vmem:[#allocation3 + $0x50] sm:$0xff] }
  0xae   :  { %682 = vst.msk [vmem:[#allocation3 + $0x78] sm:$0xff] %vm53_vm0, %v649_v42  ;;  %v745_v47 = vadd.f32 1.0, %v713_v45  ;;  %681 = vst.msk [vmem:[#allocation3 + $0x70] sm:$0xff] %vm53_vm0, %v648_v43  ;;  %v1818_v63 = vpop.eup %1817  ;;  %v744_v19 = vadd.f32 1.0, %v712_v10 }
  0xaf   :  { %v605_v49 = vpop.xlane.xlu1 %604  ;;  %908 = vperm.xlu1 %1808, %v1814_v41   ;;  %v603_v50 = vpop.xlane.xlu0 %602 }
  0xb0   :  { %v651_v53 = vadd.f32 %v605_v49, %v555_v44  ;;  %1823 = vrcp.f32 %v745_v47  ;;  %v650_v54 = vadd.f32 %v603_v50, %v554_v46  ;;  %v567_v50 = vld [vmem:[#allocation3 + $0xe8] sm:$0xff] }
  0xb1   :  { %v715_v56 = vld [vmem:[#allocation3 + $0x68] sm:$0xff]  ;;  %1825 = vrcp.f32 %v740_v48  ;;  %v714_v22 = vld [vmem:[#allocation3 + $0x60] sm:$0xff] }
  0xb2   :  { %684 = vst.msk [vmem:[#allocation3 + $0x88] sm:$0xff] %vm53_vm0, %v651_v53  ;;  %v747_v58 = vadd.f32 1.0, %v715_v56  ;;  %683 = vst.msk [vmem:[#allocation3 + $0x80] sm:$0xff] %vm53_vm0, %v650_v54  ;;  %v746_v31 = vadd.f32 1.0, %v714_v22 }
  0xb3   :  { %v609_v60 = vpop.xlane.xlu1 %608  ;;  %913 = vperm.xlu1 %1808, %v1816_v52   ;;  %v607_v61 = vpop.xlane.xlu0 %606  ;;  %v566_v52 = vld [vmem:[#allocation3 + $0xe0] sm:$0xff] }
  0xb4   :  { %v653_v0 = vadd.f32 %v609_v60, %v557_v55  ;;  %1827 = vrcp.f32 %v747_v58  ;;  %v652_v1 = vadd.f32 %v607_v61, %v556_v57 }
  0xb5   :  { %v717_v3 = vld [vmem:[#allocation3 + $0x78] sm:$0xff]  ;;  %1829 = vrcp.f32 %v741_v59  ;;  %v716_v34 = vld [vmem:[#allocation3 + $0x70] sm:$0xff] }
  0xb6   :  { %v1820_v6 = vpop.eup %1819  ;;  %686 = vst.msk [vmem:[#allocation3 + $0x98] sm:$0xff] %vm53_vm0, %v653_v0  ;;  %v749_v7 = vadd.f32 1.0, %v717_v3  ;;  %685 = vst.msk [vmem:[#allocation3 + $0x90] sm:$0xff] %vm53_vm0, %v652_v1  ;;  %v748_v43 = vadd.f32 1.0, %v716_v34  ;;  %v568_v0 = vld [vmem:[#allocation3 + $0xf0] sm:$0xff] }
  0xb7   :  { %v613_v5 = vpop.xlane.xlu1 %612  ;;  %943 = vperm.xlu0 %1807, %v1820_v6   ;;  %918 = vperm.xlu1 %1808, %v1818_v63   ;;  %v611_v9 = vpop.xlane.xlu0 %610 }
  0xb8   :  { %v1822_v11 = vpop.eup %1821  ;;  %v655_v12 = vadd.f32 %v613_v5, %v559_v2  ;;  %1831 = vrcp.f32 %v749_v7  ;;  %v654_v13 = vadd.f32 %v611_v9, %v558_v4 }
  0xb9   :  { %v719_v15 = vld [vmem:[#allocation3 + $0x88] sm:$0xff]  ;;  %1833 = vrcp.f32 %v742_v8  ;;  %v718_v46 = vld [vmem:[#allocation3 + $0x80] sm:$0xff] }
  0xba   :  { %v1824_v17 = vpop.eup %1823  ;;  %688 = vst.msk [vmem:[#allocation3 + $0xa8] sm:$0xff] %vm53_vm0, %v655_v12  ;;  %v751_v18 = vadd.f32 1.0, %v719_v15  ;;  %687 = vst.msk [vmem:[#allocation3 + $0xa0] sm:$0xff] %vm53_vm0, %v654_v13  ;;  %v750_v55 = vadd.f32 1.0, %v718_v46 }
  0xbb   :  { %v617_v20 = vpop.xlane.xlu1 %616  ;;  %953 = vperm.xlu0 %1807, %v1824_v17   ;;  %923 = vperm.xlu1 %1808, %v1822_v11   ;;  %v615_v21 = vpop.xlane.xlu0 %614 }
  0xbc   :  { %v1826_v23 = vpop.eup %1825  ;;  %v657_v24 = vadd.f32 %v617_v20, %v561_v14  ;;  %1835 = vrcp.f32 %v751_v18  ;;  %v656_v25 = vadd.f32 %v615_v21, %v560_v16 }
  0xbd   :  { %v721_v27 = vld [vmem:[#allocation3 + $0x98] sm:$0xff]  ;;  %1837 = vrcp.f32 %v744_v19  ;;  %v720_v58 = vld [vmem:[#allocation3 + $0x90] sm:$0xff] }
  0xbe   :  { %v1828_v29 = vpop.eup %1827  ;;  %690 = vst.msk [vmem:[#allocation3 + $0xb8] sm:$0xff] %vm53_vm0, %v657_v24  ;;  %v753_v30 = vadd.f32 1.0, %v721_v27  ;;  %689 = vst.msk [vmem:[#allocation3 + $0xb0] sm:$0xff] %vm53_vm0, %v656_v25  ;;  %v752_v3 = vadd.f32 1.0, %v720_v58 }
  0xbf   :  { %v621_v32 = vpop.xlane.xlu1 %620  ;;  %963 = vperm.xlu0 %1807, %v1828_v29   ;;  %928 = vperm.xlu1 %1808, %v1826_v23   ;;  %v619_v33 = vpop.xlane.xlu0 %618 }
  0xc0   :  { %v1830_v35 = vpop.eup %1829  ;;  %v659_v36 = vadd.f32 %v621_v32, %v563_v26  ;;  %1839 = vrcp.f32 %v753_v30  ;;  %v658_v37 = vadd.f32 %v619_v33, %v562_v28 }
  0xc1   :  { %v723_v39 = vld [vmem:[#allocation3 + $0xa8] sm:$0xff]  ;;  %1841 = vrcp.f32 %v746_v31  ;;  %v722_v7 = vld [vmem:[#allocation3 + $0xa0] sm:$0xff] }
  0xc2   :  { %v1832_v41 = vpop.eup %1831  ;;  %692 = vst.msk [vmem:[#allocation3 + $0xc8] sm:$0xff] %vm53_vm0, %v659_v36  ;;  %v755_v42 = vadd.f32 1.0, %v723_v39  ;;  %691 = vst.msk [vmem:[#allocation3 + $0xc0] sm:$0xff] %vm53_vm0, %v658_v37  ;;  %v754_v13 = vadd.f32 1.0, %v722_v7 }
  0xc3   :  { %v625_v44 = vpop.xlane.xlu1 %624  ;;  %973 = vperm.xlu0 %1807, %v1832_v41   ;;  %933 = vperm.xlu1 %1808, %v1830_v35   ;;  %v623_v45 = vpop.xlane.xlu0 %622 }
  0xc4   :  { %v1834_v47 = vpop.eup %1833  ;;  %v661_v48 = vadd.f32 %v625_v44, %v565_v38  ;;  %1843 = vrcp.f32 %v755_v42  ;;  %v660_v49 = vadd.f32 %v623_v45, %v564_v40 }
  0xc5   :  { %v725_v51 = vld [vmem:[#allocation3 + $0xb8] sm:$0xff]  ;;  %1845 = vrcp.f32 %v748_v43  ;;  %v724_v14 = vld [vmem:[#allocation3 + $0xb0] sm:$0xff] }
  0xc6   :  { %v1836_v53 = vpop.eup %1835  ;;  %694 = vst.msk [vmem:[#allocation3 + $0xd8] sm:$0xff] %vm53_vm0, %v661_v48  ;;  %v757_v54 = vadd.f32 1.0, %v725_v51  ;;  %693 = vst.msk [vmem:[#allocation3 + $0xd0] sm:$0xff] %vm53_vm0, %v660_v49  ;;  %v756_v19 = vadd.f32 1.0, %v724_v14  ;;  %v1876_v14 = vld [vmem:[%s2633_s1 + $0x18] sm:$0xff] }
  0xc7   :  { %v629_v56 = vpop.xlane.xlu1 %628  ;;  %983 = vperm.xlu0 %1807, %v1836_v53   ;;  %938 = vperm.xlu1 %1808, %v1834_v47   ;;  %v627_v57 = vpop.xlane.xlu0 %626 }
  0xc8   :  { %v1838_v59 = vpop.eup %1837  ;;  %v663_v60 = vadd.f32 %v629_v56, %v567_v50  ;;  %1847 = vrcp.f32 %v757_v54  ;;  %v662_v61 = vadd.f32 %v627_v57, %v566_v52 }
  0xc9   :  { %v727_v63 = vld [vmem:[#allocation3 + $0xc8] sm:$0xff]  ;;  %1849 = vrcp.f32 %v750_v55  ;;  %v726_v20 = vld [vmem:[#allocation3 + $0xc0] sm:$0xff] }
  0xca   :  { %v1840_v1 = vpop.eup %1839  ;;  %696 = vst.msk [vmem:[#allocation3 + $0xe8] sm:$0xff] %vm53_vm0, %v663_v60  ;;  %v759_v2 = vadd.f32 1.0, %v727_v63  ;;  %695 = vst.msk [vmem:[#allocation3 + $0xe0] sm:$0xff] %vm53_vm0, %v662_v61  ;;  %v758_v25 = vadd.f32 1.0, %v726_v20  ;;  %v1873_v61 = vld [vmem:[%s2633_s1] sm:$0xff] }
  0xcb   :  { %v633_v4 = vpop.xlane.xlu1 %632  ;;  %993 = vperm.xlu0 %1807, %v1840_v1   ;;  %948 = vperm.xlu1 %1808, %v1838_v59   ;;  %v631_v6 = vpop.xlane.xlu0 %630  ;;  %v1877_v20 = vld [vmem:[%s2633_s1 + $0x20] sm:$0xff] }
  0xcc   :  { %v1842_v8 = vpop.eup %1841  ;;  %v665_v5 = vadd.f32 %v633_v4, %v569_v62  ;;  %1851 = vrcp.f32 %v759_v2  ;;  %v664_v9 = vadd.f32 %v631_v6, %v568_v0  ;;  %v1874_v2 = vld [vmem:[%s2633_s1 + $0x8] sm:$0xff] }
  0xcd   :  { %v729_v10 = vld [vmem:[#allocation3 + $0xd8] sm:$0xff]  ;;  %1853 = vrcp.f32 %v752_v3  ;;  %v728_v26 = vld [vmem:[#allocation3 + $0xd0] sm:$0xff] }
  0xce   :  { %v1844_v11 = vpop.eup %1843  ;;  %698 = vst.msk [vmem:[#allocation3 + $0xf8] sm:$0xff] %vm53_vm0, %v665_v5  ;;  %v761_v12 = vadd.f32 1.0, %v729_v10  ;;  %697 = vst.msk [vmem:[#allocation3 + $0xf0] sm:$0xff] %vm53_vm0, %v664_v9  ;;  %v760_v29 = vadd.f32 1.0, %v728_v26  ;;  %v1875_v9 = vld [vmem:[%s2633_s1 + $0x10] sm:$0xff]  ;;  %v1878_v26 = vld [vmem:[%s2633_s1 + $0x28] sm:$0xff] }
  0xcf   :  { %1003 = vperm.xlu0 %1807, %v1844_v11   ;;  %958 = vperm.xlu1 %1808, %v1842_v8   ;;  %v1846_v15 = vpop.eup %1845 }
  0xd0   :  { %1855 = vrcp.f32 %v761_v12 }
  0xd1   :  { %v731_v16 = vld [vmem:[#allocation3 + $0xe8] sm:$0xff]  ;;  %1857 = vrcp.f32 %v754_v13  ;;  %v730_v30 = vld [vmem:[#allocation3 + $0xe0] sm:$0xff] }
  0xd2   :  { %v1848_v17 = vpop.eup %1847  ;;  %v763_v18 = vadd.f32 1.0, %v731_v16  ;;  %v762_v33 = vadd.f32 1.0, %v730_v30 }
  0xd3   :  { %1013 = vperm.xlu0 %1807, %v1848_v17   ;;  %968 = vperm.xlu1 %1808, %v1846_v15   ;;  %v1850_v21 = vpop.eup %1849 }
  0xd4   :  { %1859 = vrcp.f32 %v763_v18 }
  0xd5   :  { %v733_v22 = vld [vmem:[#allocation3 + $0xf8] sm:$0xff]  ;;  %1861 = vrcp.f32 %v756_v19  ;;  %v732_v34 = vld [vmem:[#allocation3 + $0xf0] sm:$0xff] }
  0xd6   :  { %v1852_v23 = vpop.eup %1851  ;;  %v765_v24 = vadd.f32 1.0, %v733_v22  ;;  %v764_v37 = vadd.f32 1.0, %v732_v34 }
  0xd7   :  { %1023 = vperm.xlu0 %1807, %v1852_v23   ;;  %978 = vperm.xlu1 %1808, %v1850_v21   ;;  %v1854_v27 = vpop.eup %1853 }
  0xd8   :  { %1863 = vrcp.f32 %v765_v24 }
  0xd9   :  { %1865 = vrcp.f32 %v758_v25 }
  0xda   :  { %v1856_v28 = vpop.eup %1855  ;;  %1867 = vrcp.f32 %v760_v29 }
  0xdb   :  { %1033 = vperm.xlu0 %1807, %v1856_v28   ;;  %988 = vperm.xlu1 %1808, %v1854_v27   ;;  %v1858_v31 = vpop.eup %1857  ;;  %1869 = vrcp.f32 %v762_v33  ;;  %v1879_v33 = vld [vmem:[%s2633_s1 + $0x30] sm:$0xff] }
  0xdc   :  { %1871 = vrcp.f32 %v764_v37 }
  0xde   :  { %v1860_v32 = vpop.eup %1859 }
  0xdf   :  { %1043 = vperm.xlu0 %1807, %v1860_v32   ;;  %998 = vperm.xlu1 %1808, %v1858_v31   ;;  %v1862_v35 = vpop.eup %1861 }
  0xe2   :  { %v1864_v36 = vpop.eup %1863 }
  0xe3   :  { %1053 = vperm.xlu0 %1807, %v1864_v36   ;;  %1008 = vperm.xlu1 %1808, %v1862_v35   ;;  %v1866_v38 = vpop.eup %1865 }
  0xe4   :  { %v1868_v39 = vpop.eup %1867 }
  0xe5   :  { %v1870_v40 = vpop.eup %1869 }
  0xe6   :  { %v1872_v41 = vpop.eup %1871 }
  0xe7   :  { %1018 = vperm.xlu1 %1808, %v1866_v38  }
  0xeb   :  { %1028 = vperm.xlu1 %1808, %v1868_v39  }
  0xef   :  { %1038 = vperm.xlu1 %1808, %v1870_v40   ;;  %v1880_v40 = vld [vmem:[%s2633_s1 + $0x38] sm:$0xff] }
  0xf3   :  { %1048 = vperm.xlu1 %1808, %v1872_v41  }
  0xfa   :  { %v1551_v42 = vpop.f32.mrb[0].mxu1 }
  0xfb   :  { %v250_v43 = vpop.f32.mrb[1].mxu1  ;;  %v865_v3 = vadd.f32 %v1874_v2, %v1551_v42 }
  0xfc   :  { %v864_v62 = vadd.f32 %v1873_v61, %v250_v43 }
  0xfe   :  { %v1554_v44 = vpop.f32.mrb[2].mxu1 }
  0xff   :  { %v260_v45 = vpop.f32.mrb[3].mxu1  ;;  %v867_v15 = vadd.f32 %v1876_v14, %v1554_v44 }
 0x100   :  { %v866_v10 = vadd.f32 %v1875_v9, %v260_v45  ;;  %v1881_v45 = vld [vmem:[%s2633_s1 + $0x40] sm:$0xff] }
 0x102   :  { %v1557_v46 = vpop.f32.mrb[4].mxu1 }
 0x103   :  { %v270_v47 = vpop.f32.mrb[5].mxu1  ;;  %v869_v27 = vadd.f32 %v1878_v26, %v1557_v46 }
 0x104   :  { %v868_v21 = vadd.f32 %v1877_v20, %v270_v47 }
 0x106   :  { %v2328_v48 = vpop.f32.mrb[6].mxu1 }
 0x107   :  { %v280_v49 = vpop.f32.mrb[7].mxu1  ;;  %v871_v41 = vadd.f32 %v1880_v40, %v2328_v48  ;;  %v1883_v48 = vld [vmem:[%s2633_s1 + $0x50] sm:$0xff]  ;;  %v1893_v40 = vld [vmem:[%s2633_s1 + $0xa0] sm:$0xff] }
 0x108   :  { %v870_v34 = vadd.f32 %v1879_v33, %v280_v49  ;;  %v1882_v49 = vld [vmem:[%s2633_s1 + $0x48] sm:$0xff] }
 0x10a   :  { %v2330_v50 = vpop.f32.mrb[8].mxu1 }
 0x10b   :  { %v2332_v51 = vpop.f32.mrb[9].mxu1  ;;  %v873_v61 = vadd.f32 %v1882_v49, %v2330_v50  ;;  %v1885_v50 = vld [vmem:[%s2633_s1 + $0x60] sm:$0xff] }
 0x10c   :  { %v872_v46 = vadd.f32 %v1881_v45, %v2332_v51  ;;  %v1884_v51 = vld [vmem:[%s2633_s1 + $0x58] sm:$0xff]  ;;  %v1895_v45 = vld [vmem:[%s2633_s1 + $0xb0] sm:$0xff] }
 0x10e   :  { %v2334_v52 = vpop.f32.mrb[10].mxu1 }
 0x10f   :  { %v2336_v53 = vpop.f32.mrb[11].mxu1 }
 0x112   :  { %v2338_v54 = vpop.f32.mrb[12].mxu1 }
 0x113   :  { %v2340_v55 = vpop.f32.mrb[13].mxu1 }
 0x114   :  { %v876_v9 = vadd.f32 %v1885_v50, %v2340_v55 }
 0x116   :  { %v2342_v56 = vpop.f32.mrb[14].mxu1 }
 0x117   :  { %v2344_v57 = vpop.f32.mrb[15].mxu1 }
 0x11a   :  { %v2346_v58 = vpop.f32.mrb[16].mxu1 }
 0x11b   :  { %v2348_v59 = vpop.f32.mrb[17].mxu1 }
 0x11e   :  { %v2350_v60 = vpop.f32.mrb[18].mxu1 }
 0x11f   :  { %v2355_v63 = vpop.f32.mrb[19].mxu1 }
 0x122   :  { %v2357_v1 = vpop.f32.mrb[20].mxu1 }
 0x123   :  { %v2362_v6 = vpop.f32.mrb[21].mxu1 }
 0x126   :  { %v899_v0 = vpop.permute.xlu0 %898  ;;  %v2364_v8 = vpop.f32.mrb[22].mxu1 }
 0x127   :  { %v1056_v4 = vmul.f32 %v899_v0, %v864_v62  ;;  %v2369_v11 = vpop.f32.mrb[23].mxu1  ;;  %v874_v0 = vadd.f32 %v1883_v48, %v2336_v53  ;;  %v1897_v48 = vld [vmem:[%s2633_s1 + $0xc0] sm:$0xff] }
 0x129   :  { %1661 = vmatprep.mubr.f32.mxu0 %v1056_v4 }
 0x12a   :  { %v904_v7 = vpop.permute.xlu1 %903  ;;  %v2371_v13 = vpop.f32.mrb[24].mxu1 }
 0x12b   :  { %v1057_v5 = vmul.f32 %v904_v7, %v865_v3  ;;  %v2376_v17 = vpop.f32.mrb[25].mxu1  ;;  %v875_v7 = vadd.f32 %v1884_v51, %v2334_v52 }
 0x12d   :  { %1662 = vmatmul.mubr.f32.vlgmr.msra.gmra.mrb[0].mxu0 %v1057_v5 }
 0x12e   :  { %v909_v12 = vpop.permute.xlu1 %908  ;;  %v2378_v19 = vpop.f32.mrb[26].mxu1 }
 0x12f   :  { %v1058_v16 = vmul.f32 %v909_v12, %v866_v10  ;;  %v2383_v23 = vpop.f32.mrb[27].mxu1  ;;  %v1886_v12 = vld [vmem:[%s2633_s1 + $0x68] sm:$0xff] }
 0x130   :  { %v877_v14 = vadd.f32 %v1886_v12, %v2338_v54 }
 0x131   :  { %1664 = vmatprep.mubr.f32.mxu0 %v1058_v16  ;;  %v1887_v16 = vld [vmem:[%s2633_s1 + $0x70] sm:$0xff] }
 0x132   :  { %v914_v18 = vpop.permute.xlu1 %913  ;;  %v2388_v29 = vpop.f32.mrb[28].mxu1 }
 0x133   :  { %v1059_v22 = vmul.f32 %v914_v18, %v867_v15  ;;  %v2390_v30 = vpop.f32.mrb[29].mxu1  ;;  %v878_v18 = vadd.f32 %v1887_v16, %v2344_v57 }
 0x135   :  { %1665 = vmatmul.mubr.f32.gmra.mrb[2].mxu0 %v1059_v22 }
 0x136   :  { %v919_v24 = vpop.permute.xlu1 %918  ;;  %v944_v25 = vpop.permute.xlu0 %943 }
 0x137   :  { %v1060_v28 = vmul.f32 %v919_v24, %v868_v21  ;;  %v2395_v36 = vpop.f32.mrb[30].mxu1  ;;  %v1065_v4 = vmul.f32 %v944_v25, %v873_v61  ;;  %v1888_v21 = vld [vmem:[%s2633_s1 + $0x78] sm:$0xff]  ;;  %v1889_v24 = vld [vmem:[%s2633_s1 + $0x80] sm:$0xff] }
 0x138   :  { %v2397_v37 = vpop.f32.mrb[31].mxu1  ;;  %v879_v22 = vadd.f32 %v1888_v21, %v2342_v56  ;;  %v880_v25 = vadd.f32 %v1889_v24, %v2348_v59  ;;  %v1896_v61 = vld [vmem:[%s2633_s1 + $0xb8] sm:$0xff] }
 0x139   :  { %1667 = vmatprep.mubr.f32.mxu0 %v1060_v28  ;;  %v1890_v28 = vld [vmem:[%s2633_s1 + $0x88] sm:$0xff] }
 0x13a   :  { %v924_v31 = vpop.permute.xlu1 %923  ;;  %v954_v32 = vpop.permute.xlu0 %953 }
 0x13b   :  { %v1061_v35 = vmul.f32 %v924_v31, %v869_v27  ;;  %v1067_v53 = vmul.f32 %v954_v32, %v875_v7  ;;  %v881_v31 = vadd.f32 %v1890_v28, %v2346_v58  ;;  %v1891_v32 = vld [vmem:[%s2633_s1 + $0x90] sm:$0xff] }
 0x13c   :  { %v882_v33 = vadd.f32 %v1891_v32, %v2355_v63 }
 0x13d   :  { %1668 = vmatmul.mubr.f32.gmra.mrb[4].mxu0 %v1061_v35  ;;  %v1892_v35 = vld [vmem:[%s2633_s1 + $0x98] sm:$0xff] }
 0x13e   :  { %v929_v38 = vpop.permute.xlu1 %928  ;;  %v964_v39 = vpop.permute.xlu0 %963 }
 0x13f   :  { %v1062_v42 = vmul.f32 %v929_v38, %v870_v34  ;;  %v1069_v55 = vmul.f32 %v964_v39, %v877_v14  ;;  %v883_v38 = vadd.f32 %v1892_v35, %v2350_v60 }
 0x141   :  { %1670 = vmatprep.mubr.f32.mxu0 %v1062_v42 }
 0x142   :  { %v934_v43 = vpop.permute.xlu1 %933  ;;  %v974_v44 = vpop.permute.xlu0 %973 }
 0x143   :  { %v1063_v47 = vmul.f32 %v934_v43, %v871_v41  ;;  %v1071_v57 = vmul.f32 %v974_v44, %v879_v22  ;;  %v884_v41 = vadd.f32 %v1893_v40, %v2362_v6  ;;  %v1894_v43 = vld [vmem:[%s2633_s1 + $0xa8] sm:$0xff] }
 0x144   :  { %v885_v44 = vadd.f32 %v1894_v43, %v2357_v1 }
 0x145   :  { %1671 = vmatmul.mubr.f32.gmra.mrb[6].mxu0 %v1063_v47 }
 0x146   :  { %v939_v62 = vpop.permute.xlu1 %938  ;;  %v984_v3 = vpop.permute.xlu0 %983 }
 0x147   :  { %v1064_v2 = vmul.f32 %v939_v62, %v872_v46  ;;  %v1073_v59 = vmul.f32 %v984_v3, %v881_v31  ;;  %v886_v46 = vadd.f32 %v1895_v45, %v2369_v11  ;;  %v887_v62 = vadd.f32 %v1896_v61, %v2364_v8  ;;  %v1898_v3 = vld [vmem:[%s2633_s1 + $0xc8] sm:$0xff]  ;;  %v826_v8 = vld [vmem:[%s2633_s1 + $0xd0] sm:$0xff] }
 0x149   :  { %1673 = vmatprep.mubr.f32.mxu0 %v1064_v2 }
 0x14a   :  { %v949_v5 = vpop.permute.xlu1 %948  ;;  %1674 = vmatmul.mubr.f32.gmra.mrb[8].mxu0 %v1065_v4  ;;  %v994_v15 = vpop.permute.xlu0 %993  ;;  %v889_v4 = vadd.f32 %v1898_v3, %v2371_v13  ;;  %v828_v13 = vld [vmem:[%s2633_s1 + $0xe0] sm:$0xff] }
 0x14b   :  { %v1066_v10 = vmul.f32 %v949_v5, %v874_v0  ;;  %v1075_v63 = vmul.f32 %v994_v15, %v883_v38  ;;  %v888_v0 = vadd.f32 %v1897_v48, %v2376_v17  ;;  %v890_v5 = vadd.f32 %v826_v8, %v2383_v23 }
 0x14c   :  { %v892_v14 = vadd.f32 %v828_v13, %v2390_v30 }
 0x14d   :  { %1676 = vmatprep.mubr.f32.mxu0 %v1066_v10 }
 0x14e   :  { %v959_v52 = vpop.permute.xlu1 %958  ;;  %1677 = vmatmul.mubr.f32.gmra.mrb[10].mxu0 %v1067_v53  ;;  %v1004_v26 = vpop.permute.xlu0 %1003 }
 0x14f   :  { %v1068_v20 = vmul.f32 %v959_v52, %v876_v9  ;;  %v1077_v6 = vmul.f32 %v1004_v26, %v885_v44  ;;  %v1899_v9 = vld [vmem:[%s2633_s1 + $0xd8] sm:$0xff]  ;;  %v1900_v52 = vld [vmem:[%s2633_s1 + $0xe8] sm:$0xff]  ;;  %v2502_v26 = vld [vmem:[%s2635_s3] ss:$0 sm:$0xff] }
 0x150   :  { %v891_v10 = vadd.f32 %v1899_v9, %v2378_v19  ;;  %v893_v16 = vadd.f32 %v1900_v52, %v2388_v29  ;;  %v830_v19 = vld [vmem:[%s2633_s1 + $0xf0] sm:$0xff] }
 0x151   :  { %1679 = vmatprep.mubr.f32.mxu0 %v1068_v20 }
 0x152   :  { %v969_v54 = vpop.permute.xlu1 %968  ;;  %1680 = vmatmul.mubr.f32.gmra.mrb[12].mxu0 %v1069_v55  ;;  %v1014_v39 = vpop.permute.xlu0 %1013  ;;  %v894_v55 = vadd.f32 %v830_v19, %v2397_v37 }
 0x153   :  { %v1070_v27 = vmul.f32 %v969_v54, %v878_v18  ;;  %v1079_v11 = vmul.f32 %v1014_v39, %v887_v62  ;;  %v831_v18 = vld [vmem:[%s2633_s1 + $0xf8] sm:$0xff] }
 0x154   :  { %v895_v22 = vadd.f32 %v2395_v36, %v831_v18 }
 0x155   :  { %1682 = vmatprep.mubr.f32.mxu0 %v1070_v27 }
 0x156   :  { %v979_v56 = vpop.permute.xlu1 %978  ;;  %1683 = vmatmul.mubr.f32.gmra.mrb[14].mxu0 %v1071_v57  ;;  %v1024_v47 = vpop.permute.xlu0 %1023 }
 0x157   :  { %v1072_v34 = vmul.f32 %v979_v56, %v880_v25  ;;  %v1081_v17 = vmul.f32 %v1024_v47, %v889_v4 }
 0x159   :  { %1685 = vmatprep.mubr.f32.mxu0 %v1072_v34 }
 0x15a   :  { %v989_v58 = vpop.permute.xlu1 %988  ;;  %1686 = vmatmul.mubr.f32.gmra.mrb[16].mxu0 %v1073_v59  ;;  %v1034_v51 = vpop.permute.xlu0 %1033 }
 0x15b   :  { %v1074_v42 = vmul.f32 %v989_v58, %v882_v33  ;;  %v1083_v23 = vmul.f32 %v1034_v51, %v891_v10 }
 0x15d   :  { %1688 = vmatprep.mubr.f32.mxu0 %v1074_v42 }
 0x15e   :  { %v999_v60 = vpop.permute.xlu1 %998  ;;  %1689 = vmatmul.mubr.f32.gmra.mrb[18].mxu0 %v1075_v63  ;;  %v1044_v12 = vpop.permute.xlu0 %1043 }
 0x15f   :  { %v1076_v49 = vmul.f32 %v999_v60, %v884_v41  ;;  %v1085_v21 = vmul.f32 %v1044_v12, %v893_v16 }
 0x161   :  { %1691 = vmatprep.mubr.f32.mxu0 %v1076_v49 }
 0x162   :  { %v1009_v1 = vpop.permute.xlu1 %1008  ;;  %1692 = vmatmul.mubr.f32.gmra.mrb[20].mxu0 %v1077_v6  ;;  %v1054_v54 = vpop.permute.xlu0 %1053 }
 0x163   :  { %v1078_v2 = vmul.f32 %v1009_v1, %v886_v46  ;;  %v1087_v25 = vmul.f32 %v1054_v54, %v895_v22 }
 0x165   :  { %1694 = vmatprep.mubr.f32.mxu0 %v1078_v2 }
 0x166   :  { %v1019_v7 = vpop.permute.xlu1 %1018  ;;  %1695 = vmatmul.mubr.f32.gmra.mrb[22].mxu0 %v1079_v11 }
 0x167   :  { %v1080_v50 = vmul.f32 %v1019_v7, %v888_v0 }
 0x169   :  { %1697 = vmatprep.mubr.f32.mxu0 %v1080_v50 }
 0x16a   :  { %v1029_v53 = vpop.permute.xlu1 %1028  ;;  %1698 = vmatmul.mubr.f32.gmra.mrb[24].mxu0 %v1081_v17 }
 0x16b   :  { %v1082_v15 = vmul.f32 %v1029_v53, %v890_v5 }
 0x16d   :  { %1700 = vmatprep.mubr.f32.mxu0 %v1082_v15 }
 0x16e   :  { %v1039_v20 = vpop.permute.xlu1 %1038  ;;  %1701 = vmatmul.mubr.f32.gmra.mrb[26].mxu0 %v1083_v23 }
 0x16f   :  { %v1084_v30 = vmul.f32 %v1039_v20, %v892_v14 }
 0x171   :  { %1703 = vmatprep.mubr.f32.mxu0 %v1084_v30 }
 0x172   :  { %v1049_v29 = vpop.permute.xlu1 %1048  ;;  %1704 = vmatmul.mubr.f32.gmra.mrb[28].mxu0 %v1085_v21 }
 0x173   :  { %v1086_v24 = vmul.f32 %v1049_v29, %v894_v55 }
 0x175   :  { %1706 = vmatprep.mubr.f32.mxu0 %v1086_v24 }
 0x176   :  { %1707 = vmatmul.mubr.f32.gmra.mrb[30].mxu0 %v1087_v25 }
 0x200   :  { %v1663_v27 = vpop.f32.mrb[0].mxu0 }
 0x201   :  { %v1183_v57 = vadd.f32 %v1663_v27, %v2502_v26  ;;  %v1177_v37 = vpop.f32.mrb[1].mxu0 }
 0x202   :  { %v1178_v28 = vadd.f32 %v2502_v26, %v1177_v37 }
 0x203   :  { %v1337_v36 = vmax.f32 %v1183_v57, 0.0 }
 0x204   :  { %v1336_v31 = vmax.f32 %v1178_v28, 0.0 }
 0x205   :  { %1369 = vst [vmem:[%s2636_s4 + $0x8] sm:$0xff] %v1337_v36 }
 0x206   :  { %1368 = vst [vmem:[%s2636_s4] sm:$0xff] %v1336_v31 }
 0x208   :  { %v1666_v56 = vpop.f32.mrb[2].mxu0 }
 0x209   :  { %v1193_v32 = vadd.f32 %v1666_v56, %v2502_v26  ;;  %v1187_v33 = vpop.f32.mrb[3].mxu0 }
 0x20a   :  { %v1188_v34 = vadd.f32 %v2502_v26, %v1187_v33 }
 0x20b   :  { %v1339_v59 = vmax.f32 %v1193_v32, 0.0 }
 0x20c   :  { %v1338_v35 = vmax.f32 %v1188_v34, 0.0 }
 0x20d   :  { %1371 = vst [vmem:[%s2636_s4 + $0x18] sm:$0xff] %v1339_v59 }
 0x20e   :  { %1370 = vst [vmem:[%s2636_s4 + $0x10] sm:$0xff] %v1338_v35 }
 0x210   :  { %v1669_v38 = vpop.f32.mrb[4].mxu0 }
 0x211   :  { %v1203_v39 = vadd.f32 %v1669_v38, %v2502_v26  ;;  %v1197_v58 = vpop.f32.mrb[5].mxu0 }
 0x212   :  { %v1198_v40 = vadd.f32 %v2502_v26, %v1197_v58 }
 0x213   :  { %v1341_v41 = vmax.f32 %v1203_v39, 0.0 }
 0x214   :  { %v1340_v42 = vmax.f32 %v1198_v40, 0.0 }
 0x215   :  { %1373 = vst [vmem:[%s2636_s4 + $0x28] sm:$0xff] %v1341_v41 }
 0x216   :  { %1372 = vst [vmem:[%s2636_s4 + $0x20] sm:$0xff] %v1340_v42 }
 0x218   :  { %v1672_v63 = vpop.f32.mrb[6].mxu0 }
 0x219   :  { %v1213_v43 = vadd.f32 %v1672_v63, %v2502_v26  ;;  %v1207_v44 = vpop.f32.mrb[7].mxu0 }
 0x21a   :  { %v1208_v60 = vadd.f32 %v2502_v26, %v1207_v44 }
 0x21b   :  { %v1343_v45 = vmax.f32 %v1213_v43, 0.0 }
 0x21c   :  { %v1342_v46 = vmax.f32 %v1208_v60, 0.0 }
 0x21d   :  { %1375 = vst [vmem:[%s2636_s4 + $0x38] sm:$0xff] %v1343_v45  ;;  %v1675_v47 = vpop.f32.mrb[8].mxu0 }
 0x21e   :  { %1374 = vst [vmem:[%s2636_s4 + $0x30] sm:$0xff] %v1342_v46  ;;  %v1223_v49 = vadd.f32 %v1675_v47, %v2502_v26  ;;  %v1217_v6 = vpop.f32.mrb[9].mxu0 }
 0x21f   :  { %v1218_v61 = vadd.f32 %v2502_v26, %v1217_v6 }
 0x220   :  { %v1345_v62 = vmax.f32 %v1223_v49, 0.0 }
 0x221   :  { %v1344_v1 = vmax.f32 %v1218_v61, 0.0  ;;  %v1678_v48 = vpop.f32.mrb[10].mxu0 }
 0x222   :  { %1377 = vst [vmem:[%s2636_s4 + $0x48] sm:$0xff] %v1345_v62  ;;  %v1233_v0 = vadd.f32 %v1678_v48, %v2502_v26  ;;  %v1227_v2 = vpop.f32.mrb[11].mxu0 }
 0x223   :  { %1376 = vst [vmem:[%s2636_s4 + $0x40] sm:$0xff] %v1344_v1  ;;  %v1228_v11 = vadd.f32 %v2502_v26, %v1227_v2 }
 0x224   :  { %v1347_v3 = vmax.f32 %v1233_v0, 0.0 }
 0x225   :  { %v1346_v4 = vmax.f32 %v1228_v11, 0.0  ;;  %v1681_v8 = vpop.f32.mrb[12].mxu0 }
 0x226   :  { %1379 = vst [vmem:[%s2636_s4 + $0x58] sm:$0xff] %v1347_v3  ;;  %v1243_v51 = vadd.f32 %v1681_v8, %v2502_v26  ;;  %v1237_v7 = vpop.f32.mrb[13].mxu0 }
 0x227   :  { %1378 = vst [vmem:[%s2636_s4 + $0x50] sm:$0xff] %v1346_v4  ;;  %v1238_v5 = vadd.f32 %v2502_v26, %v1237_v7 }
 0x228   :  { %v1349_v50 = vmax.f32 %v1243_v51, 0.0 }
 0x229   :  { %v1348_v17 = vmax.f32 %v1238_v5, 0.0  ;;  %v1684_v9 = vpop.f32.mrb[14].mxu0 }
 0x22a   :  { %1381 = vst [vmem:[%s2636_s4 + $0x68] sm:$0xff] %v1349_v50  ;;  %v1253_v10 = vadd.f32 %v1684_v9, %v2502_v26  ;;  %v1247_v13 = vpop.f32.mrb[15].mxu0 }
 0x22b   :  { %1380 = vst [vmem:[%s2636_s4 + $0x60] sm:$0xff] %v1348_v17  ;;  %v1248_v53 = vadd.f32 %v2502_v26, %v1247_v13 }
 0x22c   :  { %v1351_v12 = vmax.f32 %v1253_v10, 0.0 }
 0x22d   :  { %v1350_v14 = vmax.f32 %v1248_v53, 0.0  ;;  %v1687_v15 = vpop.f32.mrb[16].mxu0 }
 0x22e   :  { %1383 = vst [vmem:[%s2636_s4 + $0x78] sm:$0xff] %v1351_v12  ;;  %v1263_v23 = vadd.f32 %v1687_v15, %v2502_v26  ;;  %v1257_v52 = vpop.f32.mrb[17].mxu0 }
 0x22f   :  { %1382 = vst [vmem:[%s2636_s4 + $0x70] sm:$0xff] %v1350_v14  ;;  %v1258_v16 = vadd.f32 %v2502_v26, %v1257_v52 }
 0x230   :  { %v1353_v19 = vmax.f32 %v1263_v23, 0.0 }
 0x231   :  { %v1352_v18 = vmax.f32 %v1258_v16, 0.0  ;;  %v1690_v20 = vpop.f32.mrb[18].mxu0 }
 0x232   :  { %1385 = vst [vmem:[%s2636_s4 + $0x88] sm:$0xff] %v1353_v19  ;;  %v1273_v30 = vadd.f32 %v1690_v20, %v2502_v26  ;;  %v1267_v55 = vpop.f32.mrb[19].mxu0 }
 0x233   :  { %1384 = vst [vmem:[%s2636_s4 + $0x80] sm:$0xff] %v1352_v18  ;;  %v1268_v21 = vadd.f32 %v2502_v26, %v1267_v55 }
 0x234   :  { %v1355_v22 = vmax.f32 %v1273_v30, 0.0 }
 0x235   :  { %v1354_v54 = vmax.f32 %v1268_v21, 0.0  ;;  %v1693_v29 = vpop.f32.mrb[20].mxu0 }
 0x236   :  { %1387 = vst [vmem:[%s2636_s4 + $0x98] sm:$0xff] %v1355_v22  ;;  %v1283_v24 = vadd.f32 %v1693_v29, %v2502_v26  ;;  %v1277_v25 = vpop.f32.mrb[21].mxu0 }
 0x237   :  { %1386 = vst [vmem:[%s2636_s4 + $0x90] sm:$0xff] %v1354_v54  ;;  %v1278_v27 = vadd.f32 %v2502_v26, %v1277_v25 }
 0x238   :  { %v1357_v57 = vmax.f32 %v1283_v24, 0.0 }
 0x239   :  { %v1356_v37 = vmax.f32 %v1278_v27, 0.0  ;;  %v1696_v28 = vpop.f32.mrb[22].mxu0 }
 0x23a   :  { %1389 = vst [vmem:[%s2636_s4 + $0xa8] sm:$0xff] %v1357_v57  ;;  %v1293_v36 = vadd.f32 %v1696_v28, %v2502_v26  ;;  %v1287_v31 = vpop.f32.mrb[23].mxu0 }
 0x23b   :  { %1388 = vst [vmem:[%s2636_s4 + $0xa0] sm:$0xff] %v1356_v37  ;;  %v1288_v56 = vadd.f32 %v2502_v26, %v1287_v31 }
 0x23c   :  { %v1359_v32 = vmax.f32 %v1293_v36, 0.0 }
 0x23d   :  { %v1358_v33 = vmax.f32 %v1288_v56, 0.0  ;;  %v1699_v34 = vpop.f32.mrb[24].mxu0 }
 0x23e   :  { %1391 = vst [vmem:[%s2636_s4 + $0xb8] sm:$0xff] %v1359_v32  ;;  %v1303_v59 = vadd.f32 %v1699_v34, %v2502_v26  ;;  %v1297_v35 = vpop.f32.mrb[25].mxu0 }
 0x23f   :  { %1390 = vst [vmem:[%s2636_s4 + $0xb0] sm:$0xff] %v1358_v33  ;;  %v1298_v38 = vadd.f32 %v2502_v26, %v1297_v35 }
 0x240   :  { %v1361_v39 = vmax.f32 %v1303_v59, 0.0 }
 0x241   :  { %v1360_v58 = vmax.f32 %v1298_v38, 0.0  ;;  %v1702_v40 = vpop.f32.mrb[26].mxu0 }
 0x242   :  { %1393 = vst [vmem:[%s2636_s4 + $0xc8] sm:$0xff] %v1361_v39  ;;  %v1313_v41 = vadd.f32 %v1702_v40, %v2502_v26  ;;  %v1307_v42 = vpop.f32.mrb[27].mxu0 }
 0x243   :  { %1392 = vst [vmem:[%s2636_s4 + $0xc0] sm:$0xff] %v1360_v58  ;;  %v1308_v63 = vadd.f32 %v2502_v26, %v1307_v42 }
 0x244   :  { %v1363_v43 = vmax.f32 %v1313_v41, 0.0 }
 0x245   :  { %v1362_v44 = vmax.f32 %v1308_v63, 0.0  ;;  %v1705_v60 = vpop.f32.mrb[28].mxu0 }
 0x246   :  { %1395 = vst [vmem:[%s2636_s4 + $0xd8] sm:$0xff] %v1363_v43  ;;  %v1323_v45 = vadd.f32 %v1705_v60, %v2502_v26  ;;  %v1317_v46 = vpop.f32.mrb[29].mxu0 }
 0x247   :  { %1394 = vst [vmem:[%s2636_s4 + $0xd0] sm:$0xff] %v1362_v44  ;;  %v1318_v47 = vadd.f32 %v2502_v26, %v1317_v46 }
 0x248   :  { %v1365_v49 = vmax.f32 %v1323_v45, 0.0 }
 0x249   :  { %v1364_v6 = vmax.f32 %v1318_v47, 0.0  ;;  %v1708_v61 = vpop.f32.mrb[30].mxu0 }
 0x24a   :  { %1397 = vst [vmem:[%s2636_s4 + $0xe8] sm:$0xff] %v1365_v49  ;;  %v1333_v62 = vadd.f32 %v1708_v61, %v2502_v26  ;;  %v1327_v1 = vpop.f32.mrb[31].mxu0 }
 0x24b   :  { %1396 = vst [vmem:[%s2636_s4 + $0xe0] sm:$0xff] %v1364_v6  ;;  %v1328_v48 = vadd.f32 %v2502_v26, %v1327_v1 }
 0x24c   :  { %v1367_v0 = vmax.f32 %v1333_v62, 0.0 }
 0x24d   :  { %v1366_v2 = vmax.f32 %v1328_v48, 0.0 }
 0x24e   :  { %1399 = vst [vmem:[%s2636_s4 + $0xf8] sm:$0xff] %v1367_v0 }
 0x24f   :  { %1398 = vst [vmem:[%s2636_s4 + $0xf0] sm:$0xff] %v1366_v2 }

</bundles_post_ra>
